<compile_context>
chip_gen: v5e
topology: v5e:2x2
jax: 0.10.0
libtpu: 0.0.40
codegen_flags: <defaults>
</compile_context>

<pallas_src>
import functools

import jax
import jax.numpy as jnp
from jax import lax
from jax.experimental import pallas as pl
from jax.experimental.pallas import tpu as pltpu


# ----------------------------------------------------------------------------
# Fused Pallas kernel: bidirectional LSTM recurrence + FC projection
# ----------------------------------------------------------------------------
def _make_bilstm_fused_kernel(T, B, H):
    """Builds the fused fwd-LSTM + bwd-LSTM + FC kernel for static (T, B, H)."""

    def kernel(x_ref,                                  # (T*B, E)
               wih_f_ref, whh_f_ref, b_f_ref,          # (E,4H) (H,4H) (1,4H)
               wih_b_ref, whh_b_ref, b_b_ref,
               fcw_f_ref, fcw_b_ref, fcb_ref,          # (H,O)  (H,O)  (1,O)
               out_ref,                                # (T*B, O)
               gxf_sc, gxb_sc, hf_sc, hb_sc):          # VMEM scratch
        f32 = jnp.float32
        x2d = x_ref[...]

        # Hoisted input projections: ONE MXU matmul per direction (bias folded)
        # instead of T tiny matmuls sitting on the serial critical path.
        gxf_sc[...] = (jnp.dot(x2d, wih_f_ref[...],
                               preferred_element_type=f32) + b_f_ref[...])
        gxb_sc[...] = (jnp.dot(x2d, wih_b_ref[...],
                               preferred_element_type=f32) + b_b_ref[...])

        # Loop-invariant loads hoisted out of the recurrence.
        whh_f = whh_f_ref[...]
        whh_b = whh_b_ref[...]

        def lstm_cell(gx, h, c, whh):
            # PyTorch gate order: i, f, g, o.  4H == 128, so the gate vector is
            # exactly one vreg wide: run sigmoid/tanh on the full vreg (EUP
            # slot) once, then slice the 32-lane chunks.
            g = gx + jnp.dot(h, whh, preferred_element_type=f32)   # (B, 4H)
            sg = jax.nn.sigmoid(g)
            th = jnp.tanh(g)
            i_g = sg[:, 0 * H:1 * H]
            f_g = sg[:, 1 * H:2 * H]
            g_g = th[:, 2 * H:3 * H]
            o_g = sg[:, 3 * H:4 * H]
            c_new = f_g * c + i_g * g_g
            h_new = o_g * jnp.tanh(c_new)
            return h_new, c_new

        zeros = jnp.zeros((B, H), dtype=f32)
        h_f = c_f = h_b = c_b = zeros

        # T is small & static: full unroll (equivalent to fori_loop unroll=True)
        # gives the LLO scheduler visibility across steps and makes every slice
        # offset static.  Forward and backward directions are independent, so
        # their per-step work interleaves freely inside each unrolled step.
        for t in range(T):
            # forward direction, time t
            lo_f, hi_f = t * B, (t + 1) * B
            h_f, c_f = lstm_cell(gxf_sc[lo_f:hi_f, :], h_f, c_f, whh_f)
            hf_sc[lo_f:hi_f, :] = h_f
            # backward direction, time T-1-t
            tb = T - 1 - t
            lo_b, hi_b = tb * B, (tb + 1) * B
            h_b, c_b = lstm_cell(gxb_sc[lo_b:hi_b, :], h_b, c_b, whh_b)
            hb_sc[lo_b:hi_b, :] = h_b

        # Fused FC projection epilogue (fc_w split per direction: no concat).
        out_ref[...] = (jnp.dot(hf_sc[...], fcw_f_ref[...],
                                preferred_element_type=f32)
                        + jnp.dot(hb_sc[...], fcw_b_ref[...],
                                  preferred_element_type=f32)
                        + fcb_ref[...])

    return kernel


def _run_bilstm_fused(emb, params):
    """emb: (T, B, E) f32  ->  emissions (T, B, O) f32."""
    T, B, E = emb.shape
    H = params["whh_f"].shape[0]
    O = params["fc_w"].shape[1]

    # Pad batch to a multiple of 8 sublanes (f32 min tile) so the MXU sees
    # full rows; padded rows are independent in the recurrence and sliced off.
    B_pad = max(8, -(-B // 8) * 8)
    if B_pad != B:
        emb = jnp.pad(emb, ((0, 0), (0, B_pad - B), (0, 0)))
    x2d = emb.reshape(T * B_pad, E)

    fcw_f = params["fc_w"][:H]
    fcw_b = params["fc_w"][H:]

    kernel = _make_bilstm_fused_kernel(T, B_pad, H)
    vmem = pl.BlockSpec(memory_space=pltpu.MemorySpace.VMEM)
    out = pl.pallas_call(
        kernel,
        out_shape=jax.ShapeDtypeStruct((T * B_pad, O), jnp.float32),
        in_specs=[vmem] * 10,
        out_specs=vmem,
        scratch_shapes=[
            pltpu.VMEM((T * B_pad, 4 * H), jnp.float32),   # hoisted gates_x fwd
            pltpu.VMEM((T * B_pad, 4 * H), jnp.float32),   # hoisted gates_x bwd
            pltpu.VMEM((T * B_pad, H), jnp.float32),       # h fwd, all steps
            pltpu.VMEM((T * B_pad, H), jnp.float32),       # h bwd, all steps
        ],
    )(x2d,
      params["wih_f"], params["whh_f"], params["b_f"],
      params["wih_b"], params["whh_b"], params["b_b"],
      fcw_f, fcw_b, params["fc_b"])
    # TODO(synk): for large (T, B) add a batch-tile grid axis ("parallel",
    # sized for v7x's 64 MiB VMEM) and optionally split the two directions
    # across v7x's two TensorCores; unnecessary at these shapes.
    return out.reshape(T, B_pad, O)[:, :B, :]


# ----------------------------------------------------------------------------
# CRF (torchcrf-compatible semantics) -- tiny tensors, kept in plain JAX glue
# ----------------------------------------------------------------------------
def crf_decode(emissions, mask, start_t, end_t, trans):
    """Viterbi decode. emissions (T,B,n), mask (T,B) bool -> best tags (T,B)."""
    T, B, n = emissions.shape
    score0 = start_t[None, :] + emissions[0]                        # (B, n)

    def step(score, inp):
        em_i, m_i = inp
        nxt = score[:, :, None] + trans[None, :, :] + em_i[:, None, :]  # (B,n,n)
        best = jnp.max(nxt, axis=1)
        idx = jnp.argmax(nxt, axis=1)
        new_score = jnp.where(m_i[:, None], best, score)
        return new_score, idx

    score, history = lax.scan(step, score0, (emissions[1:], mask[1:]))
    score = score + end_t[None, :]
    last_tag = jnp.argmax(score, axis=1)                            # (B,)

    # TODO(synk): backtracking assumes full-length sequences; per-sequence
    # truncation for partially-masked batches is not reproduced here.
    barange = jnp.arange(B)

    def back(tag, hist_i):
        prev = hist_i[barange, tag]
        return prev, tag

    tag0, tags_rest = lax.scan(back, last_tag, history, reverse=True)
    return jnp.concatenate([tag0[None, :], tags_rest], axis=0)      # (T, B)


def crf_log_likelihood(emissions, tags, mask, start_t, end_t, trans):
    """torchcrf forward() with reduction='sum'."""
    T, B, n = emissions.shape
    maskf = mask.astype(jnp.float32)
    barange = jnp.arange(B)

    # numerator (score of provided tag sequence)
    score = start_t[tags[0]] + emissions[0, barange, tags[0]]

    def num_step(s, inp):
        em_i, tag_prev, tag_i, m_i = inp
        s = s + (trans[tag_prev, tag_i] + em_i[barange, tag_i]) * m_i
        return s, None

    score, _ = lax.scan(num_step, score,
                        (emissions[1:], tags[:-1], tags[1:], maskf[1:]))
    seq_ends = maskf.sum(0).astype(jnp.int32) - 1
    last_tags = tags[seq_ends, barange]
    score = score + end_t[last_tags]

    # denominator (log partition function)
    alpha = start_t[None, :] + emissions[0]

    def den_step(a, inp):
        em_i, m_i = inp
        nxt = jax.scipy.special.logsumexp(
            a[:, :, None] + trans[None, :, :] + em_i[:, None, :], axis=1)
        return jnp.where(m_i[:, None], nxt, a), None

    alpha, _ = lax.scan(den_step, alpha, (emissions[1:], mask[1:]))
    alpha = alpha + end_t[None, :]
    denom = jax.scipy.special.logsumexp(alpha, axis=1)
    return jnp.sum(score - denom)


# ----------------------------------------------------------------------------
# Parameters + forward
# ----------------------------------------------------------------------------
def init_params(key, input_dim, embedding_dim, hidden_dim, output_dim):
    """All parameters ~ Normal(0, 0.1), matching the module's init loop."""
    ks = jax.random.split(key, 12)
    std = 0.1
    n = lambda k, shape: std * jax.random.normal(k, shape, dtype=jnp.float32)
    H = hidden_dim
    params = {
        "embedding": n(ks[0], (input_dim, embedding_dim)),
        # LSTM weights stored pre-transposed: (E,4H)/(H,4H); gate order i,f,g,o
        "wih_f": n(ks[1], (embedding_dim, 4 * H)),
        "whh_f": n(ks[2], (H, 4 * H)),
        "b_f": (n(ks[3], (1, 4 * H)) + n(ks[4], (1, 4 * H))),   # b_ih + b_hh
        "wih_b": n(ks[5], (embedding_dim, 4 * H)),
        "whh_b": n(ks[6], (H, 4 * H)),
        "b_b": (n(ks[7], (1, 4 * H)) + n(ks[8], (1, 4 * H))),
        "fc_w": n(ks[9], (2 * H, output_dim)),
        "fc_b": n(ks[10], (1, output_dim)),
    }
    kc = jax.random.split(ks[11], 3)
    params["crf_start"] = n(kc[0], (output_dim,))
    params["crf_end"] = n(kc[1], (output_dim,))
    params["crf_trans"] = n(kc[2], (output_dim, output_dim))
    return params


@functools.partial(jax.jit, static_argnames=("tag_pad_idx", "with_tags"))
def bilstm_forward(params, words, tags, tag_pad_idx, with_tags):
    T, B = words.shape

    # Embedding lookup (glue). emb_dropout / fc_dropout: identity (eval mode).
    emb = params["embedding"][words]                                # (T, B, E)

    # Fused BiLSTM + FC (single Pallas kernel).
    fc_out = _run_bilstm_fused(emb, params)                         # (T, B, O)

    if with_tags:
        mask = tags != tag_pad_idx
    else:
        mask = jnp.ones((T, B), dtype=bool)

    crf_out = crf_decode(fc_out, mask, params["crf_start"],
                         params["crf_end"], params["crf_trans"])    # (T, B)

    if with_tags:
        crf_loss = -crf_log_likelihood(fc_out, tags, mask,
                                       params["crf_start"],
                                       params["crf_end"],
                                       params["crf_trans"])
    else:
        crf_loss = None
    return crf_out, crf_loss


# ----------------------------------------------------------------------------
if __name__ == "__main__":
    # Small shapes consistent with the module.
    input_dim = 50        # vocab size
    embedding_dim = 100
    hidden_dim = 32
    output_dim = 5        # number of tags
    word_pad_idx = 0
    tag_pad_idx = 0
    T, B = 8, 2           # seq_len, batch  (batch_first=False layout)

    key = jax.random.PRNGKey(0)
    kp, kw, kt = jax.random.split(key, 3)
    params = init_params(kp, input_dim, embedding_dim, hidden_dim, output_dim)
    words = jax.random.randint(kw, (T, B), 1, input_dim, dtype=jnp.int32)
    tags = jax.random.randint(kt, (T, B), 1, output_dim, dtype=jnp.int32)

    # Inference path (tags=None): returns (decoded tags, None).
    crf_out, crf_loss = bilstm_forward(params, words, tags, tag_pad_idx, False)
    jax.block_until_ready(crf_out)
    assert crf_out.shape == (T, B) and crf_loss is None

    # Training-style path (tags given): returns (decoded tags, -log-likelihood).
    crf_out2, crf_loss2 = bilstm_forward(params, words, tags, tag_pad_idx, True)
    jax.block_until_ready(crf_loss2)
    assert crf_out2.shape == (T, B) and bool(jnp.isfinite(crf_loss2))

    print("KERNEL_OK")
</pallas_src>

<mosaic_0001>
module attributes {stable_mosaic.version = 11 : i64} {
  func.func @kernel(%arg0: memref<64x100xf32, #tpu.memory_space<vmem>>, %arg1: memref<100x128xf32, #tpu.memory_space<vmem>>, %arg2: memref<32x128xf32, #tpu.memory_space<vmem>>, %arg3: memref<1x128xf32, #tpu.memory_space<vmem>>, %arg4: memref<100x128xf32, #tpu.memory_space<vmem>>, %arg5: memref<32x128xf32, #tpu.memory_space<vmem>>, %arg6: memref<1x128xf32, #tpu.memory_space<vmem>>, %arg7: memref<32x5xf32, #tpu.memory_space<vmem>>, %arg8: memref<32x5xf32, #tpu.memory_space<vmem>>, %arg9: memref<1x5xf32, #tpu.memory_space<vmem>>, %arg10: memref<64x5xf32, #tpu.memory_space<vmem>>, %arg11: memref<64x128xf32, #tpu.memory_space<vmem>>, %arg12: memref<64x128xf32, #tpu.memory_space<vmem>>, %arg13: memref<64x32xf32, #tpu.memory_space<vmem>>, %arg14: memref<64x32xf32, #tpu.memory_space<vmem>>) attributes {dimension_semantics = [], scalar_prefetch = 0 : i64, scratch_operands = 4 : i64, tpu.core_type = #tpu.core_type<tc>} {
    %c0 = arith.constant 0 : index
    %c0_0 = arith.constant 0 : index
    %0 = vector.load %arg0[%c0, %c0_0] : memref<64x100xf32, #tpu.memory_space<vmem>>, vector<64x100xf32>
    %c0_1 = arith.constant 0 : index
    %c0_2 = arith.constant 0 : index
    %1 = vector.load %arg1[%c0_1, %c0_2] : memref<100x128xf32, #tpu.memory_space<vmem>>, vector<100x128xf32>
    %cst = arith.constant dense<0.000000e+00> : vector<64x128xf32>
    %2 = tpu.matmul %0, %1, %cst {dimension_numbers = #tpu.dot_dimension_numbers<[1], [0], [0], [1], [0, 0, 1, 1], [], []>} : vector<64x100xf32>, vector<100x128xf32>, vector<64x128xf32> -> vector<64x128xf32>
    %c0_3 = arith.constant 0 : index
    %c0_4 = arith.constant 0 : index
    %3 = vector.load %arg3[%c0_3, %c0_4] : memref<1x128xf32, #tpu.memory_space<vmem>>, vector<1x128xf32>
    %4 = vector.broadcast %3 : vector<1x128xf32> to vector<64x128xf32>
    %5 = arith.addf %2, %4 : vector<64x128xf32>
    %c0_5 = arith.constant 0 : index
    %c0_6 = arith.constant 0 : index
    %6 = vector.load %arg11[%c0_5, %c0_6] : memref<64x128xf32, #tpu.memory_space<vmem>>, vector<64x128xf32>
    tpu.vector_store %arg11[%c0_5, %c0_6], %5 {strides = array<i32>} : memref<64x128xf32, #tpu.memory_space<vmem>>, vector<64x128xf32>,
    %c0_7 = arith.constant 0 : index
    %c0_8 = arith.constant 0 : index
    %7 = vector.load %arg4[%c0_7, %c0_8] : memref<100x128xf32, #tpu.memory_space<vmem>>, vector<100x128xf32>
    %cst_9 = arith.constant dense<0.000000e+00> : vector<64x128xf32>
    %8 = tpu.matmul %0, %7, %cst_9 {dimension_numbers = #tpu.dot_dimension_numbers<[1], [0], [0], [1], [0, 0, 1, 1], [], []>} : vector<64x100xf32>, vector<100x128xf32>, vector<64x128xf32> -> vector<64x128xf32>
    %c0_10 = arith.constant 0 : index
    %c0_11 = arith.constant 0 : index
    %9 = vector.load %arg6[%c0_10, %c0_11] : memref<1x128xf32, #tpu.memory_space<vmem>>, vector<1x128xf32>
    %10 = vector.broadcast %9 : vector<1x128xf32> to vector<64x128xf32>
    %11 = arith.addf %8, %10 : vector<64x128xf32>
    %c0_12 = arith.constant 0 : index
    %c0_13 = arith.constant 0 : index
    %12 = vector.load %arg12[%c0_12, %c0_13] : memref<64x128xf32, #tpu.memory_space<vmem>>, vector<64x128xf32>
    tpu.vector_store %arg12[%c0_12, %c0_13], %11 {strides = array<i32>} : memref<64x128xf32, #tpu.memory_space<vmem>>, vector<64x128xf32>,
    %c0_14 = arith.constant 0 : index
    %c0_15 = arith.constant 0 : index
    %13 = vector.load %arg2[%c0_14, %c0_15] : memref<32x128xf32, #tpu.memory_space<vmem>>, vector<32x128xf32>
    %c0_16 = arith.constant 0 : index
    %c0_17 = arith.constant 0 : index
    %14 = vector.load %arg5[%c0_16, %c0_17] : memref<32x128xf32, #tpu.memory_space<vmem>>, vector<32x128xf32>
    %cst_18 = arith.constant 0.000000e+00 : f32
    %15 = vector.broadcast %cst_18 : f32 to vector<8x32xf32>
    %c0_19 = arith.constant 0 : index
    %c0_20 = arith.constant 0 : index
    %16 = vector.load %arg11[%c0_19, %c0_20] : memref<64x128xf32, #tpu.memory_space<vmem>>, vector<8x128xf32>
    %cst_21 = arith.constant dense<0.000000e+00> : vector<8x128xf32>
    %17 = tpu.matmul %15, %13, %cst_21 {dimension_numbers = #tpu.dot_dimension_numbers<[1], [0], [0], [1], [0, 0, 1, 1], [], []>} : vector<8x32xf32>, vector<32x128xf32>, vector<8x128xf32> -> vector<8x128xf32>
    %18 = arith.addf %16, %17 : vector<8x128xf32>
    %19 = arith.negf %18 : vector<8x128xf32>
    %20 = math.exp %19 : vector<8x128xf32>
    %cst_22 = arith.constant 1.000000e+00 : f32
    %21 = vector.broadcast %cst_22 : f32 to vector<8x128xf32>
    %22 = arith.addf %21, %20 : vector<8x128xf32>
    %23 = arith.divf %21, %22 : vector<8x128xf32>
    %24 = math.tanh %18 : vector<8x128xf32>
    %25 = vector.extract_strided_slice %23 {offsets = [0, 0], sizes = [8, 32], strides = [1, 1]} : vector<8x128xf32> to vector<8x32xf32>
    %26 = vector.extract_strided_slice %23 {offsets = [0, 32], sizes = [8, 32], strides = [1, 1]} : vector<8x128xf32> to vector<8x32xf32>
    %27 = vector.extract_strided_slice %24 {offsets = [0, 64], sizes = [8, 32], strides = [1, 1]} : vector<8x128xf32> to vector<8x32xf32>
    %28 = vector.extract_strided_slice %23 {offsets = [0, 96], sizes = [8, 32], strides = [1, 1]} : vector<8x128xf32> to vector<8x32xf32>
    %29 = arith.mulf %26, %15 : vector<8x32xf32>
    %30 = arith.mulf %25, %27 : vector<8x32xf32>
    %31 = arith.addf %29, %30 : vector<8x32xf32>
    %32 = math.tanh %31 : vector<8x32xf32>
    %33 = arith.mulf %28, %32 : vector<8x32xf32>
    %c0_23 = arith.constant 0 : index
    %c0_24 = arith.constant 0 : index
    %34 = vector.load %arg13[%c0_23, %c0_24] : memref<64x32xf32, #tpu.memory_space<vmem>>, vector<8x32xf32>
    tpu.vector_store %arg13[%c0_23, %c0_24], %33 {strides = array<i32>} : memref<64x32xf32, #tpu.memory_space<vmem>>, vector<8x32xf32>,
    %c56 = arith.constant 56 : index
    %c0_25 = arith.constant 0 : index
    %35 = vector.load %arg12[%c56, %c0_25] : memref<64x128xf32, #tpu.memory_space<vmem>>, vector<8x128xf32>
    %cst_26 = arith.constant dense<0.000000e+00> : vector<8x128xf32>
    %36 = tpu.matmul %15, %14, %cst_26 {dimension_numbers = #tpu.dot_dimension_numbers<[1], [0], [0], [1], [0, 0, 1, 1], [], []>} : vector<8x32xf32>, vector<32x128xf32>, vector<8x128xf32> -> vector<8x128xf32>
    %37 = arith.addf %35, %36 : vector<8x128xf32>
    %38 = arith.negf %37 : vector<8x128xf32>
    %39 = math.exp %38 : vector<8x128xf32>
    %cst_27 = arith.constant 1.000000e+00 : f32
    %40 = vector.broadcast %cst_27 : f32 to vector<8x128xf32>
    %41 = arith.addf %40, %39 : vector<8x128xf32>
    %42 = arith.divf %40, %41 : vector<8x128xf32>
    %43 = math.tanh %37 : vector<8x128xf32>
    %44 = vector.extract_strided_slice %42 {offsets = [0, 0], sizes = [8, 32], strides = [1, 1]} : vector<8x128xf32> to vector<8x32xf32>
    %45 = vector.extract_strided_slice %42 {offsets = [0, 32], sizes = [8, 32], strides = [1, 1]} : vector<8x128xf32> to vector<8x32xf32>
    %46 = vector.extract_strided_slice %43 {offsets = [0, 64], sizes = [8, 32], strides = [1, 1]} : vector<8x128xf32> to vector<8x32xf32>
    %47 = vector.extract_strided_slice %42 {offsets = [0, 96], sizes = [8, 32], strides = [1, 1]} : vector<8x128xf32> to vector<8x32xf32>
    %48 = arith.mulf %45, %15 : vector<8x32xf32>
    %49 = arith.mulf %44, %46 : vector<8x32xf32>
    %50 = arith.addf %48, %49 : vector<8x32xf32>
    %51 = math.tanh %50 : vector<8x32xf32>
    %52 = arith.mulf %47, %51 : vector<8x32xf32>
    %c56_28 = arith.constant 56 : index
    %c0_29 = arith.constant 0 : index
    %53 = vector.load %arg14[%c56_28, %c0_29] : memref<64x32xf32, #tpu.memory_space<vmem>>, vector<8x32xf32>
    tpu.vector_store %arg14[%c56_28, %c0_29], %52 {strides = array<i32>} : memref<64x32xf32, #tpu.memory_space<vmem>>, vector<8x32xf32>,
    %c8 = arith.constant 8 : index
    %c0_30 = arith.constant 0 : index
    %54 = vector.load %arg11[%c8, %c0_30] : memref<64x128xf32, #tpu.memory_space<vmem>>, vector<8x128xf32>
    %cst_31 = arith.constant dense<0.000000e+00> : vector<8x128xf32>
    %55 = tpu.matmul %33, %13, %cst_31 {dimension_numbers = #tpu.dot_dimension_numbers<[1], [0], [0], [1], [0, 0, 1, 1], [], []>} : vector<8x32xf32>, vector<32x128xf32>, vector<8x128xf32> -> vector<8x128xf32>
    %56 = arith.addf %54, %55 : vector<8x128xf32>
    %57 = arith.negf %56 : vector<8x128xf32>
    %58 = math.exp %57 : vector<8x128xf32>
    %cst_32 = arith.constant 1.000000e+00 : f32
    %59 = vector.broadcast %cst_32 : f32 to vector<8x128xf32>
    %60 = arith.addf %59, %58 : vector<8x128xf32>
    %61 = arith.divf %59, %60 : vector<8x128xf32>
    %62 = math.tanh %56 : vector<8x128xf32>
    %63 = vector.extract_strided_slice %61 {offsets = [0, 0], sizes = [8, 32], strides = [1, 1]} : vector<8x128xf32> to vector<8x32xf32>
    %64 = vector.extract_strided_slice %61 {offsets = [0, 32], sizes = [8, 32], strides = [1, 1]} : vector<8x128xf32> to vector<8x32xf32>
    %65 = vector.extract_strided_slice %62 {offsets = [0, 64], sizes = [8, 32], strides = [1, 1]} : vector<8x128xf32> to vector<8x32xf32>
    %66 = vector.extract_strided_slice %61 {offsets = [0, 96], sizes = [8, 32], strides = [1, 1]} : vector<8x128xf32> to vector<8x32xf32>
    %67 = arith.mulf %64, %31 : vector<8x32xf32>
    %68 = arith.mulf %63, %65 : vector<8x32xf32>
    %69 = arith.addf %67, %68 : vector<8x32xf32>
    %70 = math.tanh %69 : vector<8x32xf32>
    %71 = arith.mulf %66, %70 : vector<8x32xf32>
    %c8_33 = arith.constant 8 : index
    %c0_34 = arith.constant 0 : index
    %72 = vector.load %arg13[%c8_33, %c0_34] : memref<64x32xf32, #tpu.memory_space<vmem>>, vector<8x32xf32>
    tpu.vector_store %arg13[%c8_33, %c0_34], %71 {strides = array<i32>} : memref<64x32xf32, #tpu.memory_space<vmem>>, vector<8x32xf32>,
    %c48 = arith.constant 48 : index
    %c0_35 = arith.constant 0 : index
    %73 = vector.load %arg12[%c48, %c0_35] : memref<64x128xf32, #tpu.memory_space<vmem>>, vector<8x128xf32>
    %cst_36 = arith.constant dense<0.000000e+00> : vector<8x128xf32>
    %74 = tpu.matmul %52, %14, %cst_36 {dimension_numbers = #tpu.dot_dimension_numbers<[1], [0], [0], [1], [0, 0, 1, 1], [], []>} : vector<8x32xf32>, vector<32x128xf32>, vector<8x128xf32> -> vector<8x128xf32>
    %75 = arith.addf %73, %74 : vector<8x128xf32>
    %76 = arith.negf %75 : vector<8x128xf32>
    %77 = math.exp %76 : vector<8x128xf32>
    %cst_37 = arith.constant 1.000000e+00 : f32
    %78 = vector.broadcast %cst_37 : f32 to vector<8x128xf32>
    %79 = arith.addf %78, %77 : vector<8x128xf32>
    %80 = arith.divf %78, %79 : vector<8x128xf32>
    %81 = math.tanh %75 : vector<8x128xf32>
    %82 = vector.extract_strided_slice %80 {offsets = [0, 0], sizes = [8, 32], strides = [1, 1]} : vector<8x128xf32> to vector<8x32xf32>
    %83 = vector.extract_strided_slice %80 {offsets = [0, 32], sizes = [8, 32], strides = [1, 1]} : vector<8x128xf32> to vector<8x32xf32>
    %84 = vector.extract_strided_slice %81 {offsets = [0, 64], sizes = [8, 32], strides = [1, 1]} : vector<8x128xf32> to vector<8x32xf32>
    %85 = vector.extract_strided_slice %80 {offsets = [0, 96], sizes = [8, 32], strides = [1, 1]} : vector<8x128xf32> to vector<8x32xf32>
    %86 = arith.mulf %83, %50 : vector<8x32xf32>
    %87 = arith.mulf %82, %84 : vector<8x32xf32>
    %88 = arith.addf %86, %87 : vector<8x32xf32>
    %89 = math.tanh %88 : vector<8x32xf32>
    %90 = arith.mulf %85, %89 : vector<8x32xf32>
    %c48_38 = arith.constant 48 : index
    %c0_39 = arith.constant 0 : index
    %91 = vector.load %arg14[%c48_38, %c0_39] : memref<64x32xf32, #tpu.memory_space<vmem>>, vector<8x32xf32>
    tpu.vector_store %arg14[%c48_38, %c0_39], %90 {strides = array<i32>} : memref<64x32xf32, #tpu.memory_space<vmem>>, vector<8x32xf32>,
    %c16 = arith.constant 16 : index
    %c0_40 = arith.constant 0 : index
    %92 = vector.load %arg11[%c16, %c0_40] : memref<64x128xf32, #tpu.memory_space<vmem>>, vector<8x128xf32>
    %cst_41 = arith.constant dense<0.000000e+00> : vector<8x128xf32>
    %93 = tpu.matmul %71, %13, %cst_41 {dimension_numbers = #tpu.dot_dimension_numbers<[1], [0], [0], [1], [0, 0, 1, 1], [], []>} : vector<8x32xf32>, vector<32x128xf32>, vector<8x128xf32> -> vector<8x128xf32>
    %94 = arith.addf %92, %93 : vector<8x128xf32>
    %95 = arith.negf %94 : vector<8x128xf32>
    %96 = math.exp %95 : vector<8x128xf32>
    %cst_42 = arith.constant 1.000000e+00 : f32
    %97 = vector.broadcast %cst_42 : f32 to vector<8x128xf32>
    %98 = arith.addf %97, %96 : vector<8x128xf32>
    %99 = arith.divf %97, %98 : vector<8x128xf32>
    %100 = math.tanh %94 : vector<8x128xf32>
    %101 = vector.extract_strided_slice %99 {offsets = [0, 0], sizes = [8, 32], strides = [1, 1]} : vector<8x128xf32> to vector<8x32xf32>
    %102 = vector.extract_strided_slice %99 {offsets = [0, 32], sizes = [8, 32], strides = [1, 1]} : vector<8x128xf32> to vector<8x32xf32>
    %103 = vector.extract_strided_slice %100 {offsets = [0, 64], sizes = [8, 32], strides = [1, 1]} : vector<8x128xf32> to vector<8x32xf32>
    %104 = vector.extract_strided_slice %99 {offsets = [0, 96], sizes = [8, 32], strides = [1, 1]} : vector<8x128xf32> to vector<8x32xf32>
    %105 = arith.mulf %102, %69 : vector<8x32xf32>
    %106 = arith.mulf %101, %103 : vector<8x32xf32>
    %107 = arith.addf %105, %106 : vector<8x32xf32>
    %108 = math.tanh %107 : vector<8x32xf32>
    %109 = arith.mulf %104, %108 : vector<8x32xf32>
    %c16_43 = arith.constant 16 : index
    %c0_44 = arith.constant 0 : index
    %110 = vector.load %arg13[%c16_43, %c0_44] : memref<64x32xf32, #tpu.memory_space<vmem>>, vector<8x32xf32>
    tpu.vector_store %arg13[%c16_43, %c0_44], %109 {strides = array<i32>} : memref<64x32xf32, #tpu.memory_space<vmem>>, vector<8x32xf32>,
    %c40 = arith.constant 40 : index
    %c0_45 = arith.constant 0 : index
    %111 = vector.load %arg12[%c40, %c0_45] : memref<64x128xf32, #tpu.memory_space<vmem>>, vector<8x128xf32>
    %cst_46 = arith.constant dense<0.000000e+00> : vector<8x128xf32>
    %112 = tpu.matmul %90, %14, %cst_46 {dimension_numbers = #tpu.dot_dimension_numbers<[1], [0], [0], [1], [0, 0, 1, 1], [], []>} : vector<8x32xf32>, vector<32x128xf32>, vector<8x128xf32> -> vector<8x128xf32>
    %113 = arith.addf %111, %112 : vector<8x128xf32>
    %114 = arith.negf %113 : vector<8x128xf32>
    %115 = math.exp %114 : vector<8x128xf32>
    %cst_47 = arith.constant 1.000000e+00 : f32
    %116 = vector.broadcast %cst_47 : f32 to vector<8x128xf32>
    %117 = arith.addf %116, %115 : vector<8x128xf32>
    %118 = arith.divf %116, %117 : vector<8x128xf32>
    %119 = math.tanh %113 : vector<8x128xf32>
    %120 = vector.extract_strided_slice %118 {offsets = [0, 0], sizes = [8, 32], strides = [1, 1]} : vector<8x128xf32> to vector<8x32xf32>
    %121 = vector.extract_strided_slice %118 {offsets = [0, 32], sizes = [8, 32], strides = [1, 1]} : vector<8x128xf32> to vector<8x32xf32>
    %122 = vector.extract_strided_slice %119 {offsets = [0, 64], sizes = [8, 32], strides = [1, 1]} : vector<8x128xf32> to vector<8x32xf32>
    %123 = vector.extract_strided_slice %118 {offsets = [0, 96], sizes = [8, 32], strides = [1, 1]} : vector<8x128xf32> to vector<8x32xf32>
    %124 = arith.mulf %121, %88 : vector<8x32xf32>
    %125 = arith.mulf %120, %122 : vector<8x32xf32>
    %126 = arith.addf %124, %125 : vector<8x32xf32>
    %127 = math.tanh %126 : vector<8x32xf32>
    %128 = arith.mulf %123, %127 : vector<8x32xf32>
    %c40_48 = arith.constant 40 : index
    %c0_49 = arith.constant 0 : index
    %129 = vector.load %arg14[%c40_48, %c0_49] : memref<64x32xf32, #tpu.memory_space<vmem>>, vector<8x32xf32>
    tpu.vector_store %arg14[%c40_48, %c0_49], %128 {strides = array<i32>} : memref<64x32xf32, #tpu.memory_space<vmem>>, vector<8x32xf32>,
    %c24 = arith.constant 24 : index
    %c0_50 = arith.constant 0 : index
    %130 = vector.load %arg11[%c24, %c0_50] : memref<64x128xf32, #tpu.memory_space<vmem>>, vector<8x128xf32>
    %cst_51 = arith.constant dense<0.000000e+00> : vector<8x128xf32>
    %131 = tpu.matmul %109, %13, %cst_51 {dimension_numbers = #tpu.dot_dimension_numbers<[1], [0], [0], [1], [0, 0, 1, 1], [], []>} : vector<8x32xf32>, vector<32x128xf32>, vector<8x128xf32> -> vector<8x128xf32>
    %132 = arith.addf %130, %131 : vector<8x128xf32>
    %133 = arith.negf %132 : vector<8x128xf32>
    %134 = math.exp %133 : vector<8x128xf32>
    %cst_52 = arith.constant 1.000000e+00 : f32
    %135 = vector.broadcast %cst_52 : f32 to vector<8x128xf32>
    %136 = arith.addf %135, %134 : vector<8x128xf32>
    %137 = arith.divf %135, %136 : vector<8x128xf32>
    %138 = math.tanh %132 : vector<8x128xf32>
    %139 = vector.extract_strided_slice %137 {offsets = [0, 0], sizes = [8, 32], strides = [1, 1]} : vector<8x128xf32> to vector<8x32xf32>
    %140 = vector.extract_strided_slice %137 {offsets = [0, 32], sizes = [8, 32], strides = [1, 1]} : vector<8x128xf32> to vector<8x32xf32>
    %141 = vector.extract_strided_slice %138 {offsets = [0, 64], sizes = [8, 32], strides = [1, 1]} : vector<8x128xf32> to vector<8x32xf32>
    %142 = vector.extract_strided_slice %137 {offsets = [0, 96], sizes = [8, 32], strides = [1, 1]} : vector<8x128xf32> to vector<8x32xf32>
    %143 = arith.mulf %140, %107 : vector<8x32xf32>
    %144 = arith.mulf %139, %141 : vector<8x32xf32>
    %145 = arith.addf %143, %144 : vector<8x32xf32>
    %146 = math.tanh %145 : vector<8x32xf32>
    %147 = arith.mulf %142, %146 : vector<8x32xf32>
    %c24_53 = arith.constant 24 : index
    %c0_54 = arith.constant 0 : index
    %148 = vector.load %arg13[%c24_53, %c0_54] : memref<64x32xf32, #tpu.memory_space<vmem>>, vector<8x32xf32>
    tpu.vector_store %arg13[%c24_53, %c0_54], %147 {strides = array<i32>} : memref<64x32xf32, #tpu.memory_space<vmem>>, vector<8x32xf32>,
    %c32 = arith.constant 32 : index
    %c0_55 = arith.constant 0 : index
    %149 = vector.load %arg12[%c32, %c0_55] : memref<64x128xf32, #tpu.memory_space<vmem>>, vector<8x128xf32>
    %cst_56 = arith.constant dense<0.000000e+00> : vector<8x128xf32>
    %150 = tpu.matmul %128, %14, %cst_56 {dimension_numbers = #tpu.dot_dimension_numbers<[1], [0], [0], [1], [0, 0, 1, 1], [], []>} : vector<8x32xf32>, vector<32x128xf32>, vector<8x128xf32> -> vector<8x128xf32>
    %151 = arith.addf %149, %150 : vector<8x128xf32>
    %152 = arith.negf %151 : vector<8x128xf32>
    %153 = math.exp %152 : vector<8x128xf32>
    %cst_57 = arith.constant 1.000000e+00 : f32
    %154 = vector.broadcast %cst_57 : f32 to vector<8x128xf32>
    %155 = arith.addf %154, %153 : vector<8x128xf32>
    %156 = arith.divf %154, %155 : vector<8x128xf32>
    %157 = math.tanh %151 : vector<8x128xf32>
    %158 = vector.extract_strided_slice %156 {offsets = [0, 0], sizes = [8, 32], strides = [1, 1]} : vector<8x128xf32> to vector<8x32xf32>
    %159 = vector.extract_strided_slice %156 {offsets = [0, 32], sizes = [8, 32], strides = [1, 1]} : vector<8x128xf32> to vector<8x32xf32>
    %160 = vector.extract_strided_slice %157 {offsets = [0, 64], sizes = [8, 32], strides = [1, 1]} : vector<8x128xf32> to vector<8x32xf32>
    %161 = vector.extract_strided_slice %156 {offsets = [0, 96], sizes = [8, 32], strides = [1, 1]} : vector<8x128xf32> to vector<8x32xf32>
    %162 = arith.mulf %159, %126 : vector<8x32xf32>
    %163 = arith.mulf %158, %160 : vector<8x32xf32>
    %164 = arith.addf %162, %163 : vector<8x32xf32>
    %165 = math.tanh %164 : vector<8x32xf32>
    %166 = arith.mulf %161, %165 : vector<8x32xf32>
    %c32_58 = arith.constant 32 : index
    %c0_59 = arith.constant 0 : index
    %167 = vector.load %arg14[%c32_58, %c0_59] : memref<64x32xf32, #tpu.memory_space<vmem>>, vector<8x32xf32>
    tpu.vector_store %arg14[%c32_58, %c0_59], %166 {strides = array<i32>} : memref<64x32xf32, #tpu.memory_space<vmem>>, vector<8x32xf32>,
    %c32_60 = arith.constant 32 : index
    %c0_61 = arith.constant 0 : index
    %168 = vector.load %arg11[%c32_60, %c0_61] : memref<64x128xf32, #tpu.memory_space<vmem>>, vector<8x128xf32>
    %cst_62 = arith.constant dense<0.000000e+00> : vector<8x128xf32>
    %169 = tpu.matmul %147, %13, %cst_62 {dimension_numbers = #tpu.dot_dimension_numbers<[1], [0], [0], [1], [0, 0, 1, 1], [], []>} : vector<8x32xf32>, vector<32x128xf32>, vector<8x128xf32> -> vector<8x128xf32>
    %170 = arith.addf %168, %169 : vector<8x128xf32>
    %171 = arith.negf %170 : vector<8x128xf32>
    %172 = math.exp %171 : vector<8x128xf32>
    %cst_63 = arith.constant 1.000000e+00 : f32
    %173 = vector.broadcast %cst_63 : f32 to vector<8x128xf32>
    %174 = arith.addf %173, %172 : vector<8x128xf32>
    %175 = arith.divf %173, %174 : vector<8x128xf32>
    %176 = math.tanh %170 : vector<8x128xf32>
    %177 = vector.extract_strided_slice %175 {offsets = [0, 0], sizes = [8, 32], strides = [1, 1]} : vector<8x128xf32> to vector<8x32xf32>
    %178 = vector.extract_strided_slice %175 {offsets = [0, 32], sizes = [8, 32], strides = [1, 1]} : vector<8x128xf32> to vector<8x32xf32>
    %179 = vector.extract_strided_slice %176 {offsets = [0, 64], sizes = [8, 32], strides = [1, 1]} : vector<8x128xf32> to vector<8x32xf32>
    %180 = vector.extract_strided_slice %175 {offsets = [0, 96], sizes = [8, 32], strides = [1, 1]} : vector<8x128xf32> to vector<8x32xf32>
    %181 = arith.mulf %178, %145 : vector<8x32xf32>
    %182 = arith.mulf %177, %179 : vector<8x32xf32>
    %183 = arith.addf %181, %182 : vector<8x32xf32>
    %184 = math.tanh %183 : vector<8x32xf32>
    %185 = arith.mulf %180, %184 : vector<8x32xf32>
    %c32_64 = arith.constant 32 : index
    %c0_65 = arith.constant 0 : index
    %186 = vector.load %arg13[%c32_64, %c0_65] : memref<64x32xf32, #tpu.memory_space<vmem>>, vector<8x32xf32>
    tpu.vector_store %arg13[%c32_64, %c0_65], %185 {strides = array<i32>} : memref<64x32xf32, #tpu.memory_space<vmem>>, vector<8x32xf32>,
    %c24_66 = arith.constant 24 : index
    %c0_67 = arith.constant 0 : index
    %187 = vector.load %arg12[%c24_66, %c0_67] : memref<64x128xf32, #tpu.memory_space<vmem>>, vector<8x128xf32>
    %cst_68 = arith.constant dense<0.000000e+00> : vector<8x128xf32>
    %188 = tpu.matmul %166, %14, %cst_68 {dimension_numbers = #tpu.dot_dimension_numbers<[1], [0], [0], [1], [0, 0, 1, 1], [], []>} : vector<8x32xf32>, vector<32x128xf32>, vector<8x128xf32> -> vector<8x128xf32>
    %189 = arith.addf %187, %188 : vector<8x128xf32>
    %190 = arith.negf %189 : vector<8x128xf32>
    %191 = math.exp %190 : vector<8x128xf32>
    %cst_69 = arith.constant 1.000000e+00 : f32
    %192 = vector.broadcast %cst_69 : f32 to vector<8x128xf32>
    %193 = arith.addf %192, %191 : vector<8x128xf32>
    %194 = arith.divf %192, %193 : vector<8x128xf32>
    %195 = math.tanh %189 : vector<8x128xf32>
    %196 = vector.extract_strided_slice %194 {offsets = [0, 0], sizes = [8, 32], strides = [1, 1]} : vector<8x128xf32> to vector<8x32xf32>
    %197 = vector.extract_strided_slice %194 {offsets = [0, 32], sizes = [8, 32], strides = [1, 1]} : vector<8x128xf32> to vector<8x32xf32>
    %198 = vector.extract_strided_slice %195 {offsets = [0, 64], sizes = [8, 32], strides = [1, 1]} : vector<8x128xf32> to vector<8x32xf32>
    %199 = vector.extract_strided_slice %194 {offsets = [0, 96], sizes = [8, 32], strides = [1, 1]} : vector<8x128xf32> to vector<8x32xf32>
    %200 = arith.mulf %197, %164 : vector<8x32xf32>
    %201 = arith.mulf %196, %198 : vector<8x32xf32>
    %202 = arith.addf %200, %201 : vector<8x32xf32>
    %203 = math.tanh %202 : vector<8x32xf32>
    %204 = arith.mulf %199, %203 : vector<8x32xf32>
    %c24_70 = arith.constant 24 : index
    %c0_71 = arith.constant 0 : index
    %205 = vector.load %arg14[%c24_70, %c0_71] : memref<64x32xf32, #tpu.memory_space<vmem>>, vector<8x32xf32>
    tpu.vector_store %arg14[%c24_70, %c0_71], %204 {strides = array<i32>} : memref<64x32xf32, #tpu.memory_space<vmem>>, vector<8x32xf32>,
    %c40_72 = arith.constant 40 : index
    %c0_73 = arith.constant 0 : index
    %206 = vector.load %arg11[%c40_72, %c0_73] : memref<64x128xf32, #tpu.memory_space<vmem>>, vector<8x128xf32>
    %cst_74 = arith.constant dense<0.000000e+00> : vector<8x128xf32>
    %207 = tpu.matmul %185, %13, %cst_74 {dimension_numbers = #tpu.dot_dimension_numbers<[1], [0], [0], [1], [0, 0, 1, 1], [], []>} : vector<8x32xf32>, vector<32x128xf32>, vector<8x128xf32> -> vector<8x128xf32>
    %208 = arith.addf %206, %207 : vector<8x128xf32>
    %209 = arith.negf %208 : vector<8x128xf32>
    %210 = math.exp %209 : vector<8x128xf32>
    %cst_75 = arith.constant 1.000000e+00 : f32
    %211 = vector.broadcast %cst_75 : f32 to vector<8x128xf32>
    %212 = arith.addf %211, %210 : vector<8x128xf32>
    %213 = arith.divf %211, %212 : vector<8x128xf32>
    %214 = math.tanh %208 : vector<8x128xf32>
    %215 = vector.extract_strided_slice %213 {offsets = [0, 0], sizes = [8, 32], strides = [1, 1]} : vector<8x128xf32> to vector<8x32xf32>
    %216 = vector.extract_strided_slice %213 {offsets = [0, 32], sizes = [8, 32], strides = [1, 1]} : vector<8x128xf32> to vector<8x32xf32>
    %217 = vector.extract_strided_slice %214 {offsets = [0, 64], sizes = [8, 32], strides = [1, 1]} : vector<8x128xf32> to vector<8x32xf32>
    %218 = vector.extract_strided_slice %213 {offsets = [0, 96], sizes = [8, 32], strides = [1, 1]} : vector<8x128xf32> to vector<8x32xf32>
    %219 = arith.mulf %216, %183 : vector<8x32xf32>
    %220 = arith.mulf %215, %217 : vector<8x32xf32>
    %221 = arith.addf %219, %220 : vector<8x32xf32>
    %222 = math.tanh %221 : vector<8x32xf32>
    %223 = arith.mulf %218, %222 : vector<8x32xf32>
    %c40_76 = arith.constant 40 : index
    %c0_77 = arith.constant 0 : index
    %224 = vector.load %arg13[%c40_76, %c0_77] : memref<64x32xf32, #tpu.memory_space<vmem>>, vector<8x32xf32>
    tpu.vector_store %arg13[%c40_76, %c0_77], %223 {strides = array<i32>} : memref<64x32xf32, #tpu.memory_space<vmem>>, vector<8x32xf32>,
    %c16_78 = arith.constant 16 : index
    %c0_79 = arith.constant 0 : index
    %225 = vector.load %arg12[%c16_78, %c0_79] : memref<64x128xf32, #tpu.memory_space<vmem>>, vector<8x128xf32>
    %cst_80 = arith.constant dense<0.000000e+00> : vector<8x128xf32>
    %226 = tpu.matmul %204, %14, %cst_80 {dimension_numbers = #tpu.dot_dimension_numbers<[1], [0], [0], [1], [0, 0, 1, 1], [], []>} : vector<8x32xf32>, vector<32x128xf32>, vector<8x128xf32> -> vector<8x128xf32>
    %227 = arith.addf %225, %226 : vector<8x128xf32>
    %228 = arith.negf %227 : vector<8x128xf32>
    %229 = math.exp %228 : vector<8x128xf32>
    %cst_81 = arith.constant 1.000000e+00 : f32
    %230 = vector.broadcast %cst_81 : f32 to vector<8x128xf32>
    %231 = arith.addf %230, %229 : vector<8x128xf32>
    %232 = arith.divf %230, %231 : vector<8x128xf32>
    %233 = math.tanh %227 : vector<8x128xf32>
    %234 = vector.extract_strided_slice %232 {offsets = [0, 0], sizes = [8, 32], strides = [1, 1]} : vector<8x128xf32> to vector<8x32xf32>
    %235 = vector.extract_strided_slice %232 {offsets = [0, 32], sizes = [8, 32], strides = [1, 1]} : vector<8x128xf32> to vector<8x32xf32>
    %236 = vector.extract_strided_slice %233 {offsets = [0, 64], sizes = [8, 32], strides = [1, 1]} : vector<8x128xf32> to vector<8x32xf32>
    %237 = vector.extract_strided_slice %232 {offsets = [0, 96], sizes = [8, 32], strides = [1, 1]} : vector<8x128xf32> to vector<8x32xf32>
    %238 = arith.mulf %235, %202 : vector<8x32xf32>
    %239 = arith.mulf %234, %236 : vector<8x32xf32>
    %240 = arith.addf %238, %239 : vector<8x32xf32>
    %241 = math.tanh %240 : vector<8x32xf32>
    %242 = arith.mulf %237, %241 : vector<8x32xf32>
    %c16_82 = arith.constant 16 : index
    %c0_83 = arith.constant 0 : index
    %243 = vector.load %arg14[%c16_82, %c0_83] : memref<64x32xf32, #tpu.memory_space<vmem>>, vector<8x32xf32>
    tpu.vector_store %arg14[%c16_82, %c0_83], %242 {strides = array<i32>} : memref<64x32xf32, #tpu.memory_space<vmem>>, vector<8x32xf32>,
    %c48_84 = arith.constant 48 : index
    %c0_85 = arith.constant 0 : index
    %244 = vector.load %arg11[%c48_84, %c0_85] : memref<64x128xf32, #tpu.memory_space<vmem>>, vector<8x128xf32>
    %cst_86 = arith.constant dense<0.000000e+00> : vector<8x128xf32>
    %245 = tpu.matmul %223, %13, %cst_86 {dimension_numbers = #tpu.dot_dimension_numbers<[1], [0], [0], [1], [0, 0, 1, 1], [], []>} : vector<8x32xf32>, vector<32x128xf32>, vector<8x128xf32> -> vector<8x128xf32>
    %246 = arith.addf %244, %245 : vector<8x128xf32>
    %247 = arith.negf %246 : vector<8x128xf32>
    %248 = math.exp %247 : vector<8x128xf32>
    %cst_87 = arith.constant 1.000000e+00 : f32
    %249 = vector.broadcast %cst_87 : f32 to vector<8x128xf32>
    %250 = arith.addf %249, %248 : vector<8x128xf32>
    %251 = arith.divf %249, %250 : vector<8x128xf32>
    %252 = math.tanh %246 : vector<8x128xf32>
    %253 = vector.extract_strided_slice %251 {offsets = [0, 0], sizes = [8, 32], strides = [1, 1]} : vector<8x128xf32> to vector<8x32xf32>
    %254 = vector.extract_strided_slice %251 {offsets = [0, 32], sizes = [8, 32], strides = [1, 1]} : vector<8x128xf32> to vector<8x32xf32>
    %255 = vector.extract_strided_slice %252 {offsets = [0, 64], sizes = [8, 32], strides = [1, 1]} : vector<8x128xf32> to vector<8x32xf32>
    %256 = vector.extract_strided_slice %251 {offsets = [0, 96], sizes = [8, 32], strides = [1, 1]} : vector<8x128xf32> to vector<8x32xf32>
    %257 = arith.mulf %254, %221 : vector<8x32xf32>
    %258 = arith.mulf %253, %255 : vector<8x32xf32>
    %259 = arith.addf %257, %258 : vector<8x32xf32>
    %260 = math.tanh %259 : vector<8x32xf32>
    %261 = arith.mulf %256, %260 : vector<8x32xf32>
    %c48_88 = arith.constant 48 : index
    %c0_89 = arith.constant 0 : index
    %262 = vector.load %arg13[%c48_88, %c0_89] : memref<64x32xf32, #tpu.memory_space<vmem>>, vector<8x32xf32>
    tpu.vector_store %arg13[%c48_88, %c0_89], %261 {strides = array<i32>} : memref<64x32xf32, #tpu.memory_space<vmem>>, vector<8x32xf32>,
    %c8_90 = arith.constant 8 : index
    %c0_91 = arith.constant 0 : index
    %263 = vector.load %arg12[%c8_90, %c0_91] : memref<64x128xf32, #tpu.memory_space<vmem>>, vector<8x128xf32>
    %cst_92 = arith.constant dense<0.000000e+00> : vector<8x128xf32>
    %264 = tpu.matmul %242, %14, %cst_92 {dimension_numbers = #tpu.dot_dimension_numbers<[1], [0], [0], [1], [0, 0, 1, 1], [], []>} : vector<8x32xf32>, vector<32x128xf32>, vector<8x128xf32> -> vector<8x128xf32>
    %265 = arith.addf %263, %264 : vector<8x128xf32>
    %266 = arith.negf %265 : vector<8x128xf32>
    %267 = math.exp %266 : vector<8x128xf32>
    %cst_93 = arith.constant 1.000000e+00 : f32
    %268 = vector.broadcast %cst_93 : f32 to vector<8x128xf32>
    %269 = arith.addf %268, %267 : vector<8x128xf32>
    %270 = arith.divf %268, %269 : vector<8x128xf32>
    %271 = math.tanh %265 : vector<8x128xf32>
    %272 = vector.extract_strided_slice %270 {offsets = [0, 0], sizes = [8, 32], strides = [1, 1]} : vector<8x128xf32> to vector<8x32xf32>
    %273 = vector.extract_strided_slice %270 {offsets = [0, 32], sizes = [8, 32], strides = [1, 1]} : vector<8x128xf32> to vector<8x32xf32>
    %274 = vector.extract_strided_slice %271 {offsets = [0, 64], sizes = [8, 32], strides = [1, 1]} : vector<8x128xf32> to vector<8x32xf32>
    %275 = vector.extract_strided_slice %270 {offsets = [0, 96], sizes = [8, 32], strides = [1, 1]} : vector<8x128xf32> to vector<8x32xf32>
    %276 = arith.mulf %273, %240 : vector<8x32xf32>
    %277 = arith.mulf %272, %274 : vector<8x32xf32>
    %278 = arith.addf %276, %277 : vector<8x32xf32>
    %279 = math.tanh %278 : vector<8x32xf32>
    %280 = arith.mulf %275, %279 : vector<8x32xf32>
    %c8_94 = arith.constant 8 : index
    %c0_95 = arith.constant 0 : index
    %281 = vector.load %arg14[%c8_94, %c0_95] : memref<64x32xf32, #tpu.memory_space<vmem>>, vector<8x32xf32>
    tpu.vector_store %arg14[%c8_94, %c0_95], %280 {strides = array<i32>} : memref<64x32xf32, #tpu.memory_space<vmem>>, vector<8x32xf32>,
    %c56_96 = arith.constant 56 : index
    %c0_97 = arith.constant 0 : index
    %282 = vector.load %arg11[%c56_96, %c0_97] : memref<64x128xf32, #tpu.memory_space<vmem>>, vector<8x128xf32>
    %cst_98 = arith.constant dense<0.000000e+00> : vector<8x128xf32>
    %283 = tpu.matmul %261, %13, %cst_98 {dimension_numbers = #tpu.dot_dimension_numbers<[1], [0], [0], [1], [0, 0, 1, 1], [], []>} : vector<8x32xf32>, vector<32x128xf32>, vector<8x128xf32> -> vector<8x128xf32>
    %284 = arith.addf %282, %283 : vector<8x128xf32>
    %285 = arith.negf %284 : vector<8x128xf32>
    %286 = math.exp %285 : vector<8x128xf32>
    %cst_99 = arith.constant 1.000000e+00 : f32
    %287 = vector.broadcast %cst_99 : f32 to vector<8x128xf32>
    %288 = arith.addf %287, %286 : vector<8x128xf32>
    %289 = arith.divf %287, %288 : vector<8x128xf32>
    %290 = math.tanh %284 : vector<8x128xf32>
    %291 = vector.extract_strided_slice %289 {offsets = [0, 0], sizes = [8, 32], strides = [1, 1]} : vector<8x128xf32> to vector<8x32xf32>
    %292 = vector.extract_strided_slice %289 {offsets = [0, 32], sizes = [8, 32], strides = [1, 1]} : vector<8x128xf32> to vector<8x32xf32>
    %293 = vector.extract_strided_slice %290 {offsets = [0, 64], sizes = [8, 32], strides = [1, 1]} : vector<8x128xf32> to vector<8x32xf32>
    %294 = vector.extract_strided_slice %289 {offsets = [0, 96], sizes = [8, 32], strides = [1, 1]} : vector<8x128xf32> to vector<8x32xf32>
    %295 = arith.mulf %292, %259 : vector<8x32xf32>
    %296 = arith.mulf %291, %293 : vector<8x32xf32>
    %297 = arith.addf %295, %296 : vector<8x32xf32>
    %298 = math.tanh %297 : vector<8x32xf32>
    %299 = arith.mulf %294, %298 : vector<8x32xf32>
    %c56_100 = arith.constant 56 : index
    %c0_101 = arith.constant 0 : index
    %300 = vector.load %arg13[%c56_100, %c0_101] : memref<64x32xf32, #tpu.memory_space<vmem>>, vector<8x32xf32>
    tpu.vector_store %arg13[%c56_100, %c0_101], %299 {strides = array<i32>} : memref<64x32xf32, #tpu.memory_space<vmem>>, vector<8x32xf32>,
    %c0_102 = arith.constant 0 : index
    %c0_103 = arith.constant 0 : index
    %301 = vector.load %arg12[%c0_102, %c0_103] : memref<64x128xf32, #tpu.memory_space<vmem>>, vector<8x128xf32>
    %cst_104 = arith.constant dense<0.000000e+00> : vector<8x128xf32>
    %302 = tpu.matmul %280, %14, %cst_104 {dimension_numbers = #tpu.dot_dimension_numbers<[1], [0], [0], [1], [0, 0, 1, 1], [], []>} : vector<8x32xf32>, vector<32x128xf32>, vector<8x128xf32> -> vector<8x128xf32>
    %303 = arith.addf %301, %302 : vector<8x128xf32>
    %304 = arith.negf %303 : vector<8x128xf32>
    %305 = math.exp %304 : vector<8x128xf32>
    %cst_105 = arith.constant 1.000000e+00 : f32
    %306 = vector.broadcast %cst_105 : f32 to vector<8x128xf32>
    %307 = arith.addf %306, %305 : vector<8x128xf32>
    %308 = arith.divf %306, %307 : vector<8x128xf32>
    %309 = math.tanh %303 : vector<8x128xf32>
    %310 = vector.extract_strided_slice %308 {offsets = [0, 0], sizes = [8, 32], strides = [1, 1]} : vector<8x128xf32> to vector<8x32xf32>
    %311 = vector.extract_strided_slice %308 {offsets = [0, 32], sizes = [8, 32], strides = [1, 1]} : vector<8x128xf32> to vector<8x32xf32>
    %312 = vector.extract_strided_slice %309 {offsets = [0, 64], sizes = [8, 32], strides = [1, 1]} : vector<8x128xf32> to vector<8x32xf32>
    %313 = vector.extract_strided_slice %308 {offsets = [0, 96], sizes = [8, 32], strides = [1, 1]} : vector<8x128xf32> to vector<8x32xf32>
    %314 = arith.mulf %311, %278 : vector<8x32xf32>
    %315 = arith.mulf %310, %312 : vector<8x32xf32>
    %316 = arith.addf %314, %315 : vector<8x32xf32>
    %317 = math.tanh %316 : vector<8x32xf32>
    %318 = arith.mulf %313, %317 : vector<8x32xf32>
    %c0_106 = arith.constant 0 : index
    %c0_107 = arith.constant 0 : index
    %319 = vector.load %arg14[%c0_106, %c0_107] : memref<64x32xf32, #tpu.memory_space<vmem>>, vector<8x32xf32>
    tpu.vector_store %arg14[%c0_106, %c0_107], %318 {strides = array<i32>} : memref<64x32xf32, #tpu.memory_space<vmem>>, vector<8x32xf32>,
    %c0_108 = arith.constant 0 : index
    %c0_109 = arith.constant 0 : index
    %320 = vector.load %arg13[%c0_108, %c0_109] : memref<64x32xf32, #tpu.memory_space<vmem>>, vector<64x32xf32>
    %c0_110 = arith.constant 0 : index
    %c0_111 = arith.constant 0 : index
    %321 = vector.load %arg7[%c0_110, %c0_111] : memref<32x5xf32, #tpu.memory_space<vmem>>, vector<32x5xf32>
    %cst_112 = arith.constant dense<0.000000e+00> : vector<64x5xf32>
    %322 = tpu.matmul %320, %321, %cst_112 {dimension_numbers = #tpu.dot_dimension_numbers<[1], [0], [0], [1], [0, 0, 1, 1], [], []>} : vector<64x32xf32>, vector<32x5xf32>, vector<64x5xf32> -> vector<64x5xf32>
    %c0_113 = arith.constant 0 : index
    %c0_114 = arith.constant 0 : index
    %323 = vector.load %arg14[%c0_113, %c0_114] : memref<64x32xf32, #tpu.memory_space<vmem>>, vector<64x32xf32>
    %c0_115 = arith.constant 0 : index
    %c0_116 = arith.constant 0 : index
    %324 = vector.load %arg8[%c0_115, %c0_116] : memref<32x5xf32, #tpu.memory_space<vmem>>, vector<32x5xf32>
    %cst_117 = arith.constant dense<0.000000e+00> : vector<64x5xf32>
    %325 = tpu.matmul %323, %324, %cst_117 {dimension_numbers = #tpu.dot_dimension_numbers<[1], [0], [0], [1], [0, 0, 1, 1], [], []>} : vector<64x32xf32>, vector<32x5xf32>, vector<64x5xf32> -> vector<64x5xf32>
    %326 = arith.addf %322, %325 : vector<64x5xf32>
    %c0_118 = arith.constant 0 : index
    %c0_119 = arith.constant 0 : index
    %327 = vector.load %arg9[%c0_118, %c0_119] : memref<1x5xf32, #tpu.memory_space<vmem>>, vector<1x5xf32>
    %328 = vector.broadcast %327 : vector<1x5xf32> to vector<64x5xf32>
    %329 = arith.addf %326, %328 : vector<64x5xf32>
    %c0_120 = arith.constant 0 : index
    %c0_121 = arith.constant 0 : index
    %330 = vector.load %arg10[%c0_120, %c0_121] : memref<64x5xf32, #tpu.memory_space<vmem>>, vector<64x5xf32>
    tpu.vector_store %arg10[%c0_120, %c0_121], %329 {strides = array<i32>} : memref<64x5xf32, #tpu.memory_space<vmem>>, vector<64x5xf32>,
    return
  }
}

</mosaic_0001>

<bundles_post_ra>
// kernel: custom-call.5
= control target key start
LH: loop header
LB: loop body
LE: loop exit
PB: predicated region body
PF: predicated region fallthrough
CT: control target
= control target key end

     0   :  { %s6_s0 = inlined_call_operand.vmem [shape: s32[7,2,5], index: 0, kind: output, shape index: {}]  }

// kernel: bilstm_forward.1
= control target key start
LH: loop header
LB: loop body
LE: loop exit
PB: predicated region body
PF: predicated region fallthrough
CT: control target
= control target key end

     0   :  { %vm85_vm0 = vcmask 1043456   ;;  %vm60_vm1 = vcmask 818176   ;;  %v1662_v42 = vmov 0.0   ;;  %vm216_vm10 = vcmask 261120   ;;  %s2253_s1 = inlined_call_operand.vmem [shape: f32[100,128], index: 1, kind: input, shape index: {}]   ;;  %s2254_s4 = inlined_call_operand.vmem [shape: f32[100,128], index: 4, kind: input, shape index: {}]   ;;  %s2255_s5 = inlined_call_operand.vmem [shape: f32[32,128], index: 5, kind: input, shape index: {}]   ;;  %s2256_s2 = inlined_call_operand.vmem [shape: f32[32,128], index: 2, kind: input, shape index: {}]   ;;  %s2257_s3 = inlined_call_operand.vmem [shape: f32[1,128], index: 3, kind: input, shape index: {}]   ;;  %s2258_s0 = inlined_call_operand.vmem [shape: f32[64,100], index: 0, kind: input, shape index: {}]   ;;  %s2259_s6 = inlined_call_operand.vmem [shape: f32[1,128], index: 6, kind: input, shape index: {}]   ;;  %s2260_s7 = inlined_call_operand.vmem [shape: f32[32,5], index: 7, kind: input, shape index: {}]   ;;  %s2261_s8 = inlined_call_operand.vmem [shape: f32[32,5], index: 8, kind: input, shape index: {}]   ;;  %s2262_s9 = inlined_call_operand.vmem [shape: f32[1,5], index: 9, kind: input, shape index: {}]   ;;  %s2263_s10 = inlined_call_operand.vmem [shape: f32[64,5], index: 10, kind: output, shape index: {}]  }
   0x1   :  { %v55_v0 = vld [vmem:[%s2253_s1 + $0x60] sm:$0xf]  ;;  %v54_v2 = vld [vmem:[%s2253_s1 + $0x58] sm:$0xff]  ;;  %v53_v4 = vld [vmem:[%s2253_s1 + $0x50] sm:$0xff] }
   0x2   :  { %v150_v1 = vld [vmem:[%s2254_s4 + $0x60] sm:$0xf]  ;;  %1450 = vmatpush.msk.msra.mxu0 %vm85_vm0, %v55_v0  ;;  %v149_v3 = vld [vmem:[%s2254_s4 + $0x58] sm:$0xff]  ;;  %v148_v5 = vld [vmem:[%s2254_s4 + $0x50] sm:$0xff] }
   0x3   :  { %1459 = vmatpush.msk.msra.mxu1 %vm85_vm0, %v150_v1  ;;  %v52_v6 = vld [vmem:[%s2253_s1 + $0x48] sm:$0xff]  ;;  %v51_v8 = vld [vmem:[%s2253_s1 + $0x40] sm:$0xff]  ;;  %v50_v10 = vld [vmem:[%s2253_s1 + $0x38] sm:$0xff] }
   0x4   :  { %93 = vmatpush.msra.mxu0 %v54_v2  ;;  %v147_v7 = vld [vmem:[%s2254_s4 + $0x48] sm:$0xff]  ;;  %v146_v9 = vld [vmem:[%s2254_s4 + $0x40] sm:$0xff]  ;;  %v145_v11 = vld [vmem:[%s2254_s4 + $0x38] sm:$0xff] }
   0x5   :  { %162 = vmatpush.msra.mxu1 %v149_v3  ;;  %v1759_v12 = vld [vmem:[%s2255_s5 + $0x18] sm:$0xff]  ;;  %v49_v14 = vld [vmem:[%s2253_s1 + $0x30] sm:$0xff]  ;;  %v48_v17 = vld [vmem:[%s2253_s1 + $0x28] sm:$0xff] }
   0x6   :  { %94 = vmatpush.msra.mxu0 %v53_v4  ;;  %v1764_v13 = vld [vmem:[%s2256_s2 + $0x18] sm:$0xff]  ;;  %v144_v15 = vld [vmem:[%s2254_s4 + $0x30] sm:$0xff]  ;;  %428 = vmatpush.msra.mxu3 %v1759_v12  ;;  %v143_v18 = vld [vmem:[%s2254_s4 + $0x28] sm:$0xff] }
   0x7   :  { %163 = vmatpush.msra.mxu1 %v148_v5  ;;  %362 = vmatpush.msra.mxu2 %v1764_v13  ;;  %v1777_v16 = vld [vmem:[%s2255_s5 + $0x10] sm:$0xff]  ;;  %v47_v19 = vld [vmem:[%s2253_s1 + $0x20] sm:$0xff]  ;;  %v46_v21 = vld [vmem:[%s2253_s1 + $0x18] sm:$0xff] }
   0x8   :  { %95 = vmatpush.msra.mxu0 %v52_v6  ;;  %429 = vmatpush.msra.mxu3 %v1777_v16  ;;  %v142_v20 = vld [vmem:[%s2254_s4 + $0x20] sm:$0xff]  ;;  %v141_v22 = vld [vmem:[%s2254_s4 + $0x18] sm:$0xff]  ;;  %v45_v23 = vld [vmem:[%s2253_s1 + $0x10] sm:$0xff] }
   0x9   :  { %164 = vmatpush.msra.mxu1 %v147_v7  ;;  %v140_v24 = vld [vmem:[%s2254_s4 + $0x10] sm:$0xff]  ;;  %v44_v26 = vld [vmem:[%s2253_s1 + $0x8] sm:$0xff]  ;;  %v43_v28 = vld [vmem:[%s2253_s1] sm:$0xff] }
   0xa   :  { %96 = vmatpush.msra.mxu0 %v51_v8  ;;  %v1807_v25 = vld [vmem:[%s2256_s2 + $0x10] sm:$0xff]  ;;  %v139_v27 = vld [vmem:[%s2254_s4 + $0x8] sm:$0xff]  ;;  %v138_v29 = vld [vmem:[%s2254_s4] sm:$0xff] }
   0xb   :  { %165 = vmatpush.msra.mxu1 %v146_v9  ;;  %363 = vmatpush.msra.mxu2 %v1807_v25  ;;  %v35_v30 = vld [vmem:[%s2258_s0] sm:$0xff]  ;;  %v1832_v31 = vld [vmem:[%s2255_s5 + $0x8] sm:$0xff]  ;;  %v37_v34 = vld [vmem:[%s2258_s0 + $0x10] sm:$0xff] }
   0xc   :  { %97 = vmatpush.msra.mxu0 %v50_v10  ;;  %430 = vmatpush.msra.mxu3 %v1832_v31  ;;  %v36_v32 = vld [vmem:[%s2258_s0 + $0x8] sm:$0xff]  ;;  %v1858_v35 = vld [vmem:[%s2255_s5] sm:$0xff]  ;;  %v38_v36 = vld [vmem:[%s2258_s0 + $0x18] sm:$0xff] }
   0xd   :  { %166 = vmatpush.msra.mxu1 %v145_v11  ;;  %v1846_v33 = vld [vmem:[%s2256_s2 + $0x8] sm:$0xff]  ;;  %v1873_v37 = vld [vmem:[%s2256_s2] sm:$0xff]  ;;  %v41_v40 = vld [vmem:[%s2258_s0 + $0x30] sm:$0xff] }
   0xe   :  { %98 = vmatpush.msra.mxu0 %v49_v14  ;;  %364 = vmatpush.msra.mxu2 %v1846_v33  ;;  %v39_v38 = vld [vmem:[%s2258_s0 + $0x20] sm:$0xff]  ;;  %v40_v39 = vld [vmem:[%s2258_s0 + $0x28] sm:$0xff]  ;;  %v42_v41 = vld [vmem:[%s2258_s0 + $0x38] sm:$0xff]  ;;  %s1663_s0 = smov 64  }
   0xf   :  { %167 = vmatpush.msra.mxu1 %v144_v15  ;;  %431 = vmatpush.msra.mxu3 %v1858_v35  ;;  %v1526_v43 = vld [vmem:[%s2259_s6] ss:$0 sm:$0xff] }
  0x10   :  { %99 = vmatpush.msra.mxu0 %v48_v17  ;;  %365 = vmatpush.msra.mxu2 %v1873_v37  ;;  %v1525_v47 = vld [vmem:[%s2257_s3] ss:$0 sm:$0xff]  ;;  %s1664_s3 = smov 32  }
  0x11   :  { %168 = vmatpush.msra.mxu1 %v143_v18  ;;  %560 = vmatpush.msrb.mxu3 %v1759_v12 }
  0x12   :  { %100 = vmatpush.msra.mxu0 %v47_v19  ;;  %494 = vmatpush.msrb.mxu2 %v1764_v13 }
  0x13   :  { %169 = vmatpush.msra.mxu1 %v142_v20  ;;  %561 = vmatpush.msrb.mxu3 %v1777_v16 }
  0x14   :  { %101 = vmatpush.msra.mxu0 %v46_v21  ;;  %495 = vmatpush.msrb.mxu2 %v1807_v25 }
  0x15   :  { %170 = vmatpush.msra.mxu1 %v141_v22  ;;  %562 = vmatpush.msrb.mxu3 %v1832_v31 }
  0x16   :  { %102 = vmatpush.msra.mxu0 %v45_v23  ;;  %496 = vmatpush.msrb.mxu2 %v1846_v33 }
  0x17   :  { %171 = vmatpush.msra.mxu1 %v140_v24  ;;  %563 = vmatpush.msrb.mxu3 %v1858_v35 }
  0x18   :  { %103 = vmatpush.msra.mxu0 %v44_v26  ;;  %497 = vmatpush.msrb.mxu2 %v1873_v37 }
  0x19   :  { %172 = vmatpush.msra.mxu1 %v139_v27 }
  0x1a   :  { %104 = vmatpush.msra.mxu0 %v43_v28 }
  0x1b   :  { %173 = vmatpush.msra.mxu1 %v138_v29  ;;  %1451 = vmatmul.msk.f32.vlgmr.msra.gmra.mxu0 %vm60_vm1, %v35_v30 }
  0x1c   :  { %1460 = vmatmul.msk.f32.vlgmr.msra.gmra.mxu1 %vm60_vm1, %v35_v30  ;;  %232 = vmatpush.msrb.mxu0 %v1764_v13 }
  0x1d   :  { %296 = vmatpush.msrb.mxu1 %v1759_v12 }
  0x1e   :  { %233 = vmatpush.msrb.mxu0 %v1807_v25 }
  0x1f   :  { %297 = vmatpush.msrb.mxu1 %v1777_v16 }
  0x20   :  { %234 = vmatpush.msrb.mxu0 %v1846_v33 }
  0x21   :  { %298 = vmatpush.msrb.mxu1 %v1832_v31 }
  0x22   :  { %235 = vmatpush.msrb.mxu0 %v1873_v37 }
  0x23   :  { %1452 = vmatmul.msk.f32.gmra.mxu0 %vm60_vm1, %v36_v32  ;;  %299 = vmatpush.msrb.mxu1 %v1858_v35 }
  0x24   :  { %1461 = vmatmul.msk.f32.gmra.mxu1 %vm60_vm1, %v36_v32 }
  0x2b   :  { %1453 = vmatmul.msk.f32.gmra.mxu0 %vm60_vm1, %v37_v34 }
  0x2c   :  { %1462 = vmatmul.msk.f32.gmra.mxu1 %vm60_vm1, %v37_v34 }
  0x33   :  { %1454 = vmatmul.msk.f32.gmra.mxu0 %vm60_vm1, %v38_v36 }
  0x34   :  { %1463 = vmatmul.msk.f32.gmra.mxu1 %vm60_vm1, %v38_v36 }
  0x3b   :  { %1455 = vmatmul.msk.f32.gmra.mxu0 %vm60_vm1, %v39_v38 }
  0x3c   :  { %1464 = vmatmul.msk.f32.gmra.mxu1 %vm60_vm1, %v39_v38 }
  0x43   :  { %1456 = vmatmul.msk.f32.gmra.mxu0 %vm60_vm1, %v40_v39 }
  0x44   :  { %1465 = vmatmul.msk.f32.gmra.mxu1 %vm60_vm1, %v40_v39 }
  0x4b   :  { %1457 = vmatmul.msk.f32.gmra.mxu0 %vm60_vm1, %v41_v40 }
  0x4c   :  { %1466 = vmatmul.msk.f32.gmra.mxu1 %vm60_vm1, %v41_v40 }
  0x53   :  { %1458 = vmatmul.msk.f32.gmra.mxu0 %vm60_vm1, %v42_v41 }
  0x54   :  { %1467 = vmatmul.msk.f32.gmra.mxu1 %vm60_vm1, %v42_v41 }
  0x5b   :  { %236 = vmatmul.f32.vlgmr.msrb.gmra.mxu0 %v1662_v42 }
  0x5c   :  { %300 = vmatmul.f32.vlgmr.msrb.gmra.mxu1 %v1662_v42 }
  0x98   :  { %v106_v44 = vpop.f32.mrf.mxu0 }
  0x99   :  { %v175_v45 = vpop.f32.mrf.mxu1  ;;  %v107_v18 = vadd.f32 %v1525_v47, %v106_v44 }
  0x9a   :  { %v1905_v46 = vadd.f32 %v1526_v43, %v175_v45 }
  0xa0   :  { %v109_v48 = vpop.f32.mrf.mxu0 }
  0xa1   :  { %v178_v49 = vpop.f32.mrf.mxu1  ;;  %v1910_v50 = vadd.f32 %v1525_v47, %v109_v48 }
  0xa2   :  { %v1912_v51 = vadd.f32 %v1526_v43, %v178_v49 }
  0xa8   :  { %v112_v52 = vpop.f32.mrf.mxu0 }
  0xa9   :  { %v181_v53 = vpop.f32.mrf.mxu1  ;;  %v1914_v54 = vadd.f32 %v1525_v47, %v112_v52 }
  0xaa   :  { %v1916_v55 = vadd.f32 %v1526_v43, %v181_v53 }
  0xb0   :  { %v115_v56 = vpop.f32.mrf.mxu0 }
  0xb1   :  { %v184_v57 = vpop.f32.mrf.mxu1  ;;  %v1918_v58 = vadd.f32 %v1525_v47, %v115_v56 }
  0xb2   :  { %v1920_v59 = vadd.f32 %v1526_v43, %v184_v57 }
  0xb8   :  { %v118_v60 = vpop.f32.mrf.mxu0 }
  0xb9   :  { %v187_v61 = vpop.f32.mrf.mxu1  ;;  %v1922_v62 = vadd.f32 %v1525_v47, %v118_v60 }
  0xba   :  { %v1924_v63 = vadd.f32 %v1526_v43, %v187_v61 }
  0xc0   :  { %v121_v0 = vpop.f32.mrf.mxu0 }
  0xc1   :  { %v190_v1 = vpop.f32.mrf.mxu1  ;;  %v1926_v2 = vadd.f32 %v1525_v47, %v121_v0 }
  0xc2   :  { %v1928_v3 = vadd.f32 %v1526_v43, %v190_v1 }
  0xc8   :  { %v124_v4 = vpop.f32.mrf.mxu0 }
  0xc9   :  { %v193_v5 = vpop.f32.mrf.mxu1  ;;  %v1930_v6 = vadd.f32 %v1525_v47, %v124_v4 }
  0xca   :  { %v1932_v7 = vadd.f32 %v1526_v43, %v193_v5 }
  0xd0   :  { %v127_v8 = vpop.f32.mrf.mxu0 }
  0xd1   :  { %v196_v9 = vpop.f32.mrf.mxu1  ;;  %v1934_v10 = vadd.f32 %v1525_v47, %v127_v8 }
  0xd2   :  { %v197_v11 = vadd.f32 %v1526_v43, %v196_v9 }
  0xd8   :  { %v237_v17 = vpop.f32.mrf.mxu0 }
  0xd9   :  { %v301_v14 = vpop.f32.mrf.mxu1  ;;  %v240_v19 = vadd.f32 %v237_v17, %v107_v18 }
  0xda   :  { %v304_v15 = vadd.f32 %v301_v14, %v197_v11 }
  0xdb   :  { %v1468_v23 = vmul.f32 -1.442695, %v240_v19 }
  0xdc   :  { %1528 = vtanh.f32 %v304_v15  ;;  %v1469_v22 = vmul.f32 -1.442695, %v304_v15 }
  0xdd   :  { %1530 = vtanh.f32 %v240_v19 }
  0xde   :  { %1532 = vpow2.f32 %v1469_v22  ;;  %v1953_v22 = vld [vmem:[%s2260_s7 + $0x18] sm:$0xff] }
  0xdf   :  { %1534 = vpow2.f32 %v1468_v23  ;;  %v1958_v23 = vld [vmem:[%s2260_s7 + $0x10] sm:$0xff]  ;;  %1396 = vmatpush.msra.mxu1 %v1953_v22 }
  0xe1   :  { %1397 = vmatpush.msra.mxu1 %v1958_v23 }
  0xe2   :  { %v1529_v20 = vpop.eup %1528 }
  0xe3   :  { %327 = vrot.lane.b32.xlu0 %v1529_v20, %s1663_s0  ;;  %v1531_v21 = vpop.eup %1530 }
  0xe4   :  { %v1533_v24 = vpop.eup %1532 }
  0xe5   :  { %v308_v26 = vadd.f32 1.0, %v1533_v24  ;;  %v1535_v27 = vpop.eup %1534  ;;  %v1964_v24 = vld [vmem:[%s2260_s7 + $0x8] sm:$0xff] }
  0xe6   :  { %v244_v28 = vadd.f32 1.0, %v1535_v27  ;;  %1398 = vmatpush.msra.mxu1 %v1964_v24 }
  0xe7   :  { %1536 = vrcp.f32 %v308_v26  ;;  %v320_v41 = vand.u32 2147483648, %v308_v26  ;;  %vm314_vm3 = vweird.f32 %v308_v26  ;;  %v318_v42 = vand.u32 2147483647, %v308_v26 }
  0xe8   :  { %1538 = vrcp.f32 %v244_v28  ;;  %v256_v53 = vand.u32 2147483648, %v244_v28  ;;  %vm250_vm7 = vweird.f32 %v244_v28  ;;  %v254_v56 = vand.u32 2147483647, %v244_v28 }
  0xe9   :  { %v321_v45 = vor.u32 1.1754944e-38, %v320_v41  ;;  %vm319_vm5 = vcmp.eq.f32.partialorder %v318_v42, 8.507059e+37 }
  0xea   :  { %v257_v60 = vor.u32 1.1754944e-38, %v256_v53  ;;  %vm255_vm9 = vcmp.eq.f32.partialorder %v254_v56, 8.507059e+37 }
  0xeb   :  { %263 = vrot.lane.b32.xlu0 %v1531_v21, %s1663_s0 }
  0xed   :  { %v1537_v29 = vpop.eup %1536 }
  0xee   :  { %v310_v30 = vmul.f32 %v1537_v29, %v308_v26  ;;  %v1539_v34 = vpop.eup %1538  ;;  %vm315_vm2 = vweird.f32 %v1537_v29  ;;  %v1970_v26 = vld [vmem:[%s2260_s7] sm:$0xff] }
  0xef   :  { %v246_v38 = vmul.f32 %v1539_v34, %v244_v28  ;;  %vm316_vm4 = vmor %vm314_vm3, %vm315_vm2  ;;  %vm251_vm6 = vweird.f32 %v1539_v34  ;;  %1399 = vmatpush.msra.mxu1 %v1970_v26 }
  0xf0   :  { %v311_v32 = vsub.f32 1.0, %v310_v30  ;;  %vm252_vm8 = vmor %vm250_vm7, %vm251_vm6 }
  0xf1   :  { %v247_v40 = vsub.f32 1.0, %v246_v38 }
  0xf2   :  { %v312_v36 = vmul.f32 %v1537_v29, %v311_v32 }
  0xf3   :  { %v248_v44 = vmul.f32 %v1539_v34, %v247_v40 }
  0xf4   :  { %v313_v39 = vadd.f32 %v1537_v29, %v312_v36 }
  0xf5   :  { %v249_v52 = vadd.f32 %v1539_v34, %v248_v44 }
  0xf6   :  { %v317_v43 = vsel %vm316_vm4, %v1537_v29, %v313_v39 }
  0xf7   :  { %v322_v48 = vsel %vm319_vm5, %v321_v45, %v317_v43  ;;  %v253_v57 = vsel %vm252_vm8, %v1539_v34, %v249_v52 }
  0xf8   :  { %v258_v0 = vsel %vm255_vm9, %v257_v60, %v253_v57  ;;  %v325_v4 = vmul.f32 0.0, %v322_v48 }
  0xf9   :  { %v261_v9 = vmul.f32 0.0, %v258_v0 }
 0x155   :  { %v328_v47 = vpop.permute.xlu0 %327 }
 0x156   :  { %v330_v49 = vmul.f32 %v328_v47, %v322_v48 }
 0x158   :  { %332 = vrot.lane.b32.xlu1 %v330_v49, %s1664_s3 }
 0x15d   :  { %v264_v61 = vpop.permute.xlu0 %263 }
 0x15e   :  { %v266_v1 = vmul.f32 %v264_v61, %v258_v0 }
 0x160   :  { %268 = vrot.lane.b32.xlu1 %v266_v1, %s1664_s3 }
 0x1ca   :  { %v333_v5 = vpop.permute.xlu1 %332 }
 0x1cb   :  { %v1940_v8 = vadd.f32 %v333_v5, %v325_v4 }
 0x1cd   :  { %1540 = vtanh.f32 %v1940_v8 }
 0x1d2   :  { %v269_v11 = vpop.permute.xlu1 %268 }
 0x1d3   :  { %v1541_v14 = vpop.eup %1540  ;;  %v1943_v15 = vadd.f32 %v269_v11, %v261_v9 }
 0x1d4   :  { %338 = vrot.lane.b32.xlu2 %v1541_v14, %s1663_s0 }
 0x1d5   :  { %1542 = vtanh.f32 %v1943_v15 }
 0x1db   :  { %v1543_v17 = vpop.eup %1542 }
 0x1dc   :  { %274 = vrot.lane.b32.xlu2 %v1543_v17, %s1663_s0 }
 0x22e   :  { %v339_v18 = vpop.permute.xlu2 %338 }
 0x22f   :  { %v341_v19 = vmul.f32 %v339_v18, %v322_v48 }
 0x231   :  { %343 = vrot.lane.b32.xlu0 %v341_v19, %s1664_s3 }
 0x236   :  { %v275_v20 = vpop.permute.xlu2 %274 }
 0x237   :  { %v277_v21 = vmul.f32 %v275_v20, %v258_v0 }
 0x239   :  { %279 = vrot.lane.b32.xlu1 %v277_v21, %s1664_s3 }
 0x2a3   :  { %v344_v27 = vpop.permute.xlu0 %343 }
 0x2a4   :  { %346 = vst.msk [vmem:[#allocation5 + $0x38] sm:$0xff] %vm216_vm10, %v344_v27  ;;  %1472 = vmatmul.msk.f32.vlgmr.msra.gmra.mxu3 %vm216_vm10, %v344_v27 }
 0x2a5   :  { %692 = vmatpush.msra.mxu3 %v1759_v12 }
 0x2a7   :  { %693 = vmatpush.msra.mxu3 %v1777_v16 }
 0x2a9   :  { %694 = vmatpush.msra.mxu3 %v1832_v31 }
 0x2ab   :  { %v280_v28 = vpop.permute.xlu1 %279  ;;  %695 = vmatpush.msra.mxu3 %v1858_v35 }
 0x2ac   :  { %282 = vst.msk [vmem:[#allocation4] sm:$0xff] %vm216_vm10, %v280_v28  ;;  %1470 = vmatmul.msk.f32.vlgmr.msra.gmra.mxu2 %vm216_vm10, %v280_v28 }
 0x2ad   :  { %626 = vmatpush.msra.mxu2 %v1764_v13 }
 0x2af   :  { %627 = vmatpush.msra.mxu2 %v1807_v25 }
 0x2b1   :  { %628 = vmatpush.msra.mxu2 %v1846_v33 }
 0x2b3   :  { %v1271_v29 = vld [vmem:[#allocation4] sm:$0xff]  ;;  %629 = vmatpush.msra.mxu2 %v1873_v37 }
 0x2b4   :  { %1506 = vmatmul.msk.f32.vlgmr.msra.gmra.mxu1 %vm216_vm10, %v1271_v29 }
 0x327   :  { %v433_v30 = vpop.f32.mrf.mxu3 }
 0x328   :  { %v436_v32 = vadd.f32 %v433_v30, %v1932_v7 }
 0x32a   :  { %1544 = vtanh.f32 %v436_v32  ;;  %v1473_v40 = vmul.f32 -1.442695, %v436_v32 }
 0x32f   :  { %v367_v34 = vpop.f32.mrf.mxu2 }
 0x330   :  { %v1545_v36 = vpop.eup %1544  ;;  %v370_v38 = vadd.f32 %v367_v34, %v1910_v50 }
 0x331   :  { %459 = vrot.lane.b32.xlu2 %v1545_v36, %s1663_s0 }
 0x332   :  { %1546 = vtanh.f32 %v370_v38  ;;  %v1471_v7 = vmul.f32 -1.442695, %v370_v38 }
 0x333   :  { %1548 = vpow2.f32 %v1473_v40 }
 0x338   :  { %v1547_v39 = vpop.eup %1546 }
 0x339   :  { %393 = vrot.lane.b32.xlu0 %v1547_v39, %s1663_s0  ;;  %v1549_v41 = vpop.eup %1548 }
 0x33a   :  { %v440_v42 = vadd.f32 1.0, %v1549_v41 }
 0x33c   :  { %1550 = vrcp.f32 %v440_v42  ;;  %v452_v50 = vand.u32 2147483648, %v440_v42  ;;  %vm446_vm12 = vweird.f32 %v440_v42  ;;  %v450_v49 = vand.u32 2147483647, %v440_v42 }
 0x33d   :  { %1552 = vpow2.f32 %v1471_v7 }
 0x33e   :  { %v453_v56 = vor.u32 1.1754944e-38, %v452_v50  ;;  %vm451_vm14 = vcmp.eq.f32.partialorder %v450_v49, 8.507059e+37 }
 0x342   :  { %v1551_v43 = vpop.eup %1550 }
 0x343   :  { %v442_v44 = vmul.f32 %v1551_v43, %v440_v42  ;;  %vm447_vm11 = vweird.f32 %v1551_v43  ;;  %v1553_v52 = vpop.eup %1552 }
 0x344   :  { %vm448_vm13 = vmor %vm446_vm12, %vm447_vm11  ;;  %v374_v57 = vadd.f32 1.0, %v1553_v52 }
 0x345   :  { %v443_v45 = vsub.f32 1.0, %v442_v44 }
 0x346   :  { %1554 = vrcp.f32 %v374_v57  ;;  %v386_v14 = vand.u32 2147483648, %v374_v57  ;;  %vm380_vm0 = vweird.f32 %v374_v57  ;;  %v384_v17 = vand.u32 2147483647, %v374_v57 }
 0x347   :  { %v444_v47 = vmul.f32 %v1551_v43, %v443_v45 }
 0x348   :  { %v387_v19 = vor.u32 1.1754944e-38, %v386_v14  ;;  %vm385_vm2 = vcmp.eq.f32.partialorder %v384_v17, 8.507059e+37 }
 0x349   :  { %v445_v48 = vadd.f32 %v1551_v43, %v444_v47 }
 0x34b   :  { %v449_v53 = vsel %vm448_vm13, %v1551_v43, %v445_v48 }
 0x34c   :  { %v454_v60 = vsel %vm451_vm14, %v453_v56, %v449_v53  ;;  %v1555_v1 = vpop.eup %1554 }
 0x34d   :  { %v376_v4 = vmul.f32 %v1555_v1, %v374_v57  ;;  %vm381_vm15 = vweird.f32 %v1555_v1  ;;  %v457_v28 = vmul.f32 %v454_v60, %v1940_v8 }
 0x34e   :  { %vm382_vm1 = vmor %vm380_vm0, %vm381_vm15 }
 0x34f   :  { %v377_v5 = vsub.f32 1.0, %v376_v4 }
 0x351   :  { %v378_v9 = vmul.f32 %v1555_v1, %v377_v5 }
 0x353   :  { %v379_v11 = vadd.f32 %v1555_v1, %v378_v9 }
 0x355   :  { %v383_v18 = vsel %vm382_vm1, %v1555_v1, %v379_v11 }
 0x356   :  { %v388_v21 = vsel %vm385_vm2, %v387_v19, %v383_v18 }
 0x357   :  { %v391_v32 = vmul.f32 %v388_v21, %v1943_v15 }
 0x38b   :  { %v460_v61 = vpop.permute.xlu2 %459 }
 0x38c   :  { %v462_v0 = vmul.f32 %v460_v61, %v454_v60 }
 0x38e   :  { %464 = vrot.lane.b32.xlu1 %v462_v0, %s1664_s3 }
 0x3ab   :  { %v394_v20 = vpop.permute.xlu0 %393 }
 0x3ac   :  { %v396_v27 = vmul.f32 %v394_v20, %v388_v21 }
 0x3ae   :  { %398 = vrot.lane.b32.xlu2 %v396_v27, %s1664_s3 }
 0x400   :  { %v465_v29 = vpop.permute.xlu1 %464 }
 0x401   :  { %v1994_v30 = vadd.f32 %v465_v29, %v457_v28 }
 0x403   :  { %1556 = vtanh.f32 %v1994_v30 }
 0x408   :  { %v399_v34 = vpop.permute.xlu2 %398 }
 0x409   :  { %v1557_v36 = vpop.eup %1556  ;;  %v1998_v38 = vadd.f32 %v399_v34, %v391_v32 }
 0x40a   :  { %470 = vrot.lane.b32.xlu0 %v1557_v36, %s1663_s0 }
 0x40b   :  { %1558 = vtanh.f32 %v1998_v38 }
 0x411   :  { %v1559_v39 = vpop.eup %1558 }
 0x412   :  { %404 = vrot.lane.b32.xlu1 %v1559_v39, %s1663_s0 }
 0x47c   :  { %v471_v40 = vpop.permute.xlu0 %470 }
 0x47d   :  { %v473_v8 = vmul.f32 %v471_v40, %v454_v60 }
 0x47f   :  { %475 = vrot.lane.b32.xlu2 %v473_v8, %s1664_s3 }
 0x484   :  { %v405_v41 = vpop.permute.xlu1 %404 }
 0x485   :  { %v407_v42 = vmul.f32 %v405_v41, %v388_v21 }
 0x487   :  { %409 = vrot.lane.b32.xlu0 %v407_v42, %s1664_s3 }
 0x4d9   :  { %v476_v15 = vpop.permute.xlu2 %475 }
 0x4da   :  { %478 = vst.msk [vmem:[#allocation5 + $0x30] sm:$0xff] %vm216_vm10, %v476_v15  ;;  %1476 = vmatmul.msk.f32.vlgmr.msrb.gmra.mxu3 %vm216_vm10, %v476_v15 }
 0x4db   :  { %824 = vmatpush.msrb.mxu3 %v1759_v12 }
 0x4dd   :  { %825 = vmatpush.msrb.mxu3 %v1777_v16 }
 0x4df   :  { %826 = vmatpush.msrb.mxu3 %v1832_v31 }
 0x4e1   :  { %827 = vmatpush.msrb.mxu3 %v1858_v35 }
 0x4f9   :  { %v410_v43 = vpop.permute.xlu0 %409 }
 0x4fa   :  { %412 = vst.msk [vmem:[#allocation4 + $0x8] sm:$0xff] %vm216_vm10, %v410_v43  ;;  %1474 = vmatmul.msk.f32.vlgmr.msrb.gmra.mxu2 %vm216_vm10, %v410_v43 }
 0x4fb   :  { %758 = vmatpush.msrb.mxu2 %v1764_v13 }
 0x4fd   :  { %759 = vmatpush.msrb.mxu2 %v1807_v25 }
 0x4ff   :  { %760 = vmatpush.msrb.mxu2 %v1846_v33 }
 0x501   :  { %v1272_v44 = vld [vmem:[#allocation4 + $0x8] sm:$0xff]  ;;  %761 = vmatpush.msrb.mxu2 %v1873_v37 }
 0x502   :  { %1507 = vmatmul.msk.f32.gmra.mxu1 %vm216_vm10, %v1272_v44 }
 0x55d   :  { %v565_v45 = vpop.f32.mrf.mxu3 }
 0x55e   :  { %v568_v7 = vadd.f32 %v565_v45, %v1928_v3 }
 0x560   :  { %1560 = vtanh.f32 %v568_v7  ;;  %v1477_v52 = vmul.f32 -1.442695, %v568_v7 }
 0x566   :  { %v1561_v47 = vpop.eup %1560 }
 0x567   :  { %591 = vrot.lane.b32.xlu1 %v1561_v47, %s1663_s0 }
 0x57d   :  { %v499_v48 = vpop.f32.mrf.mxu2 }
 0x57e   :  { %v502_v50 = vadd.f32 %v499_v48, %v1914_v54 }
 0x580   :  { %1562 = vtanh.f32 %v502_v50  ;;  %v1475_v53 = vmul.f32 -1.442695, %v502_v50 }
 0x581   :  { %1564 = vpow2.f32 %v1477_v52 }
 0x582   :  { %1566 = vpow2.f32 %v1475_v53 }
 0x586   :  { %v1563_v49 = vpop.eup %1562 }
 0x587   :  { %525 = vrot.lane.b32.xlu2 %v1563_v49, %s1663_s0  ;;  %v1565_v56 = vpop.eup %1564 }
 0x588   :  { %v572_v57 = vadd.f32 1.0, %v1565_v56  ;;  %v1567_v60 = vpop.eup %1566 }
 0x589   :  { %v506_v3 = vadd.f32 1.0, %v1567_v60 }
 0x58a   :  { %1568 = vrcp.f32 %v572_v57  ;;  %v584_v14 = vand.u32 2147483648, %v572_v57  ;;  %vm578_vm4 = vweird.f32 %v572_v57  ;;  %v582_v17 = vand.u32 2147483647, %v572_v57 }
 0x58b   :  { %1570 = vrcp.f32 %v506_v3  ;;  %v518_v32 = vand.u32 2147483648, %v506_v3  ;;  %vm512_vm8 = vweird.f32 %v506_v3  ;;  %v516_v34 = vand.u32 2147483647, %v506_v3 }
 0x58c   :  { %v585_v20 = vor.u32 1.1754944e-38, %v584_v14  ;;  %vm583_vm6 = vcmp.eq.f32.partialorder %v582_v17, 8.507059e+37 }
 0x58d   :  { %v519_v39 = vor.u32 1.1754944e-38, %v518_v32  ;;  %vm517_vm11 = vcmp.eq.f32.partialorder %v516_v34, 8.507059e+37 }
 0x590   :  { %v1569_v61 = vpop.eup %1568 }
 0x591   :  { %v574_v0 = vmul.f32 %v1569_v61, %v572_v57  ;;  %v1571_v4 = vpop.eup %1570  ;;  %vm579_vm3 = vweird.f32 %v1569_v61 }
 0x592   :  { %v508_v54 = vmul.f32 %v1571_v4, %v506_v3  ;;  %vm580_vm5 = vmor %vm578_vm4, %vm579_vm3  ;;  %vm513_vm7 = vweird.f32 %v1571_v4 }
 0x593   :  { %v575_v1 = vsub.f32 1.0, %v574_v0  ;;  %vm514_vm9 = vmor %vm512_vm8, %vm513_vm7 }
 0x594   :  { %v509_v11 = vsub.f32 1.0, %v508_v54 }
 0x595   :  { %v576_v5 = vmul.f32 %v1569_v61, %v575_v1 }
 0x596   :  { %v510_v19 = vmul.f32 %v1571_v4, %v509_v11 }
 0x597   :  { %v577_v9 = vadd.f32 %v1569_v61, %v576_v5 }
 0x598   :  { %v511_v29 = vadd.f32 %v1571_v4, %v510_v19 }
 0x599   :  { %v581_v18 = vsel %vm580_vm5, %v1569_v61, %v577_v9 }
 0x59a   :  { %v586_v27 = vsel %vm583_vm6, %v585_v20, %v581_v18  ;;  %v515_v36 = vsel %vm514_vm9, %v1571_v4, %v511_v29 }
 0x59b   :  { %v520_v40 = vsel %vm517_vm11, %v519_v39, %v515_v36  ;;  %v589_v42 = vmul.f32 %v586_v27, %v1994_v30 }
 0x59c   :  { %v523_v44 = vmul.f32 %v520_v40, %v1998_v38 }
 0x5d9   :  { %v592_v21 = vpop.permute.xlu1 %591 }
 0x5da   :  { %v594_v28 = vmul.f32 %v592_v21, %v586_v27 }
 0x5dc   :  { %596 = vrot.lane.b32.xlu0 %v594_v28, %s1664_s3 }
 0x5e1   :  { %v526_v8 = vpop.permute.xlu2 %525 }
 0x5e2   :  { %v528_v41 = vmul.f32 %v526_v8, %v520_v40 }
 0x5e4   :  { %530 = vrot.lane.b32.xlu1 %v528_v41, %s1664_s3 }
 0x64e   :  { %v597_v15 = vpop.permute.xlu0 %596 }
 0x64f   :  { %v2025_v43 = vadd.f32 %v597_v15, %v589_v42 }
 0x651   :  { %1572 = vtanh.f32 %v2025_v43 }
 0x656   :  { %v531_v45 = vpop.permute.xlu1 %530 }
 0x657   :  { %v1573_v7 = vpop.eup %1572  ;;  %v2029_v47 = vadd.f32 %v531_v45, %v523_v44 }
 0x658   :  { %602 = vrot.lane.b32.xlu2 %v1573_v7, %s1663_s0 }
 0x659   :  { %1574 = vtanh.f32 %v2029_v47 }
 0x65f   :  { %v1575_v48 = vpop.eup %1574 }
 0x660   :  { %536 = vrot.lane.b32.xlu0 %v1575_v48, %s1663_s0 }
 0x6b2   :  { %v603_v50 = vpop.permute.xlu2 %602 }
 0x6b3   :  { %v605_v30 = vmul.f32 %v603_v50, %v586_v27 }
 0x6b5   :  { %607 = vrot.lane.b32.xlu1 %v605_v30, %s1664_s3 }
 0x6d2   :  { %v537_v49 = vpop.permute.xlu0 %536 }
 0x6d3   :  { %v539_v52 = vmul.f32 %v537_v49, %v520_v40 }
 0x6d5   :  { %541 = vrot.lane.b32.xlu2 %v539_v52, %s1664_s3 }
 0x727   :  { %v608_v38 = vpop.permute.xlu1 %607 }
 0x728   :  { %610 = vst.msk [vmem:[#allocation5 + $0x28] sm:$0xff] %vm216_vm10, %v608_v38  ;;  %1480 = vmatmul.msk.f32.vlgmr.msra.gmra.mxu3 %vm216_vm10, %v608_v38 }
 0x729   :  { %956 = vmatpush.msra.mxu3 %v1759_v12 }
 0x72b   :  { %957 = vmatpush.msra.mxu3 %v1777_v16 }
 0x72d   :  { %958 = vmatpush.msra.mxu3 %v1832_v31 }
 0x72f   :  { %v542_v53 = vpop.permute.xlu2 %541  ;;  %959 = vmatpush.msra.mxu3 %v1858_v35 }
 0x730   :  { %544 = vst.msk [vmem:[#allocation4 + $0x10] sm:$0xff] %vm216_vm10, %v542_v53  ;;  %1478 = vmatmul.msk.f32.vlgmr.msra.gmra.mxu2 %vm216_vm10, %v542_v53 }
 0x731   :  { %890 = vmatpush.msra.mxu2 %v1764_v13 }
 0x733   :  { %891 = vmatpush.msra.mxu2 %v1807_v25 }
 0x735   :  { %892 = vmatpush.msra.mxu2 %v1846_v33 }
 0x737   :  { %893 = vmatpush.msra.mxu2 %v1873_v37 }
 0x7ab   :  { %v697_v56 = vpop.f32.mrf.mxu3 }
 0x7ac   :  { %v700_v57 = vadd.f32 %v697_v56, %v1924_v63 }
 0x7ae   :  { %1576 = vtanh.f32 %v700_v57  ;;  %v1481_v1 = vmul.f32 -1.442695, %v700_v57 }
 0x7b3   :  { %v631_v60 = vpop.f32.mrf.mxu2 }
 0x7b4   :  { %v1577_v3 = vpop.eup %1576  ;;  %v634_v61 = vadd.f32 %v631_v60, %v1918_v58 }
 0x7b5   :  { %723 = vrot.lane.b32.xlu0 %v1577_v3, %s1663_s0 }
 0x7b6   :  { %1578 = vtanh.f32 %v634_v61  ;;  %v1479_v4 = vmul.f32 -1.442695, %v634_v61 }
 0x7b7   :  { %1580 = vpow2.f32 %v1481_v1 }
 0x7b8   :  { %1582 = vpow2.f32 %v1479_v4 }
 0x7bc   :  { %v1579_v0 = vpop.eup %1578 }
 0x7bd   :  { %657 = vrot.lane.b32.xlu1 %v1579_v0, %s1663_s0  ;;  %v1581_v5 = vpop.eup %1580 }
 0x7be   :  { %v704_v54 = vadd.f32 1.0, %v1581_v5  ;;  %v1583_v9 = vpop.eup %1582 }
 0x7bf   :  { %v638_v63 = vadd.f32 1.0, %v1583_v9 }
 0x7c0   :  { %1584 = vrcp.f32 %v704_v54  ;;  %v716_v27 = vand.u32 2147483648, %v704_v54  ;;  %vm710_vm13 = vweird.f32 %v704_v54  ;;  %v714_v28 = vand.u32 2147483647, %v704_v54 }
 0x7c1   :  { %1586 = vrcp.f32 %v638_v63  ;;  %v650_v41 = vand.u32 2147483648, %v638_v63  ;;  %vm644_vm1 = vweird.f32 %v638_v63  ;;  %v648_v42 = vand.u32 2147483647, %v638_v63 }
 0x7c2   :  { %v717_v34 = vor.u32 1.1754944e-38, %v716_v27  ;;  %vm715_vm15 = vcmp.eq.f32.partialorder %v714_v28, 8.507059e+37 }
 0x7c3   :  { %v651_v44 = vor.u32 1.1754944e-38, %v650_v41  ;;  %vm649_vm3 = vcmp.eq.f32.partialorder %v648_v42, 8.507059e+37 }
 0x7c6   :  { %v1585_v11 = vpop.eup %1584 }
 0x7c7   :  { %v706_v14 = vmul.f32 %v1585_v11, %v704_v54  ;;  %v1587_v58 = vpop.eup %1586  ;;  %vm711_vm12 = vweird.f32 %v1585_v11 }
 0x7c8   :  { %v640_v19 = vmul.f32 %v1587_v58, %v638_v63  ;;  %vm712_vm14 = vmor %vm710_vm13, %vm711_vm12  ;;  %vm645_vm0 = vweird.f32 %v1587_v58 }
 0x7c9   :  { %v707_v17 = vsub.f32 1.0, %v706_v14  ;;  %vm646_vm2 = vmor %vm644_vm1, %vm645_vm0 }
 0x7ca   :  { %v641_v21 = vsub.f32 1.0, %v640_v19 }
 0x7cb   :  { %v708_v18 = vmul.f32 %v1585_v11, %v707_v17 }
 0x7cc   :  { %v642_v32 = vmul.f32 %v1587_v58, %v641_v21 }
 0x7cd   :  { %v709_v20 = vadd.f32 %v1585_v11, %v708_v18 }
 0x7ce   :  { %v643_v8 = vadd.f32 %v1587_v58, %v642_v32 }
 0x7cf   :  { %v713_v29 = vsel %vm712_vm14, %v1585_v11, %v709_v20 }
 0x7d0   :  { %v718_v39 = vsel %vm715_vm15, %v717_v34, %v713_v29  ;;  %v647_v15 = vsel %vm646_vm2, %v1587_v58, %v643_v8 }
 0x7d1   :  { %v652_v7 = vsel %vm649_vm3, %v651_v44, %v647_v15  ;;  %v721_v50 = vmul.f32 %v718_v39, %v2025_v43 }
 0x7d2   :  { %v655_v38 = vmul.f32 %v652_v7, %v2029_v47 }
 0x827   :  { %v724_v36 = vpop.permute.xlu0 %723 }
 0x828   :  { %v726_v40 = vmul.f32 %v724_v36, %v718_v39 }
 0x82a   :  { %728 = vrot.lane.b32.xlu2 %v726_v40, %s1664_s3 }
 0x82f   :  { %v658_v45 = vpop.permute.xlu1 %657 }
 0x830   :  { %v660_v48 = vmul.f32 %v658_v45, %v652_v7 }
 0x832   :  { %662 = vrot.lane.b32.xlu0 %v660_v48, %s1664_s3 }
 0x884   :  { %v729_v30 = vpop.permute.xlu2 %728 }
 0x885   :  { %v2055_v49 = vadd.f32 %v729_v30, %v721_v50 }
 0x887   :  { %1588 = vtanh.f32 %v2055_v49 }
 0x88d   :  { %v1589_v52 = vpop.eup %1588 }
 0x88e   :  { %734 = vrot.lane.b32.xlu1 %v1589_v52, %s1663_s0 }
 0x8a4   :  { %v663_v53 = vpop.permute.xlu0 %662 }
 0x8a5   :  { %v2060_v56 = vadd.f32 %v663_v53, %v655_v38 }
 0x8a7   :  { %1590 = vtanh.f32 %v2060_v56 }
 0x8ad   :  { %v1591_v57 = vpop.eup %1590 }
 0x8ae   :  { %668 = vrot.lane.b32.xlu2 %v1591_v57, %s1663_s0 }
 0x900   :  { %v735_v60 = vpop.permute.xlu1 %734 }
 0x901   :  { %v737_v43 = vmul.f32 %v735_v60, %v718_v39 }
 0x903   :  { %739 = vrot.lane.b32.xlu0 %v737_v43, %s1664_s3 }
 0x908   :  { %v669_v3 = vpop.permute.xlu2 %668 }
 0x909   :  { %v671_v61 = vmul.f32 %v669_v3, %v652_v7 }
 0x90b   :  { %673 = vrot.lane.b32.xlu1 %v671_v61, %s1664_s3  ;;  %v1656_v61 = vld [vmem:[%s2255_s5 + $0x18] sm:$0xff] }
 0x975   :  { %v740_v0 = vpop.permute.xlu0 %739 }
 0x976   :  { %742 = vst.msk [vmem:[#allocation5 + $0x20] sm:$0xff] %vm216_vm10, %v740_v0  ;;  %1484 = vmatmul.msk.f32.vlgmr.msrb.gmra.mxu3 %vm216_vm10, %v740_v0  ;;  %v1657_v0 = vld [vmem:[%s2255_s5 + $0x10] sm:$0xff] }
 0x977   :  { %1088 = vmatpush.msrb.mxu3 %v1759_v12 }
 0x979   :  { %1089 = vmatpush.msrb.mxu3 %v1777_v16 }
 0x97b   :  { %1090 = vmatpush.msrb.mxu3 %v1832_v31 }
 0x97d   :  { %v674_v47 = vpop.permute.xlu1 %673  ;;  %1091 = vmatpush.msrb.mxu3 %v1858_v35 }
 0x97e   :  { %676 = vst.msk [vmem:[#allocation4 + $0x18] sm:$0xff] %vm216_vm10, %v674_v47  ;;  %1482 = vmatmul.msk.f32.vlgmr.msrb.gmra.mxu2 %vm216_vm10, %v674_v47  ;;  %v1658_v47 = vld [vmem:[%s2255_s5 + $0x8] sm:$0xff] }
 0x97f   :  { %1022 = vmatpush.msrb.mxu2 %v1764_v13 }
 0x981   :  { %1023 = vmatpush.msrb.mxu2 %v1807_v25 }
 0x983   :  { %1024 = vmatpush.msrb.mxu2 %v1846_v33 }
 0x985   :  { %1025 = vmatpush.msrb.mxu2 %v1873_v37 }
 0x9f9   :  { %v829_v12 = vpop.f32.mrf.mxu3 }
 0x9fa   :  { %v832_v16 = vadd.f32 %v829_v12, %v1920_v59 }
 0x9fc   :  { %1592 = vtanh.f32 %v832_v16  ;;  %v1485_v13 = vmul.f32 -1.442695, %v832_v16  ;;  %v1659_v16 = vld [vmem:[%s2256_s2 + $0x18] sm:$0xff] }
 0xa01   :  { %v763_v31 = vpop.f32.mrf.mxu2 }
 0xa02   :  { %v1593_v1 = vpop.eup %1592  ;;  %v766_v4 = vadd.f32 %v763_v31, %v1922_v62  ;;  %v1660_v31 = vld [vmem:[%s2256_s2 + $0x10] sm:$0xff] }
 0xa03   :  { %855 = vrot.lane.b32.xlu2 %v1593_v1, %s1663_s0  ;;  %v1661_v1 = vld [vmem:[%s2256_s2 + $0x8] sm:$0xff] }
 0xa04   :  { %1594 = vtanh.f32 %v766_v4  ;;  %v1483_v59 = vmul.f32 -1.442695, %v766_v4 }
 0xa05   :  { %1596 = vpow2.f32 %v1485_v13 }
 0xa0a   :  { %v1595_v5 = vpop.eup %1594 }
 0xa0b   :  { %789 = vrot.lane.b32.xlu0 %v1595_v5, %s1663_s0  ;;  %v1597_v25 = vpop.eup %1596 }
 0xa0c   :  { %v836_v33 = vadd.f32 1.0, %v1597_v25 }
 0xa0e   :  { %1598 = vrcp.f32 %v836_v33  ;;  %v848_v62 = vand.u32 2147483648, %v836_v33  ;;  %vm842_vm5 = vweird.f32 %v836_v33  ;;  %v846_v17 = vand.u32 2147483647, %v836_v33 }
 0xa0f   :  { %1600 = vpow2.f32 %v1483_v59 }
 0xa10   :  { %v849_v19 = vor.u32 1.1754944e-38, %v848_v62  ;;  %vm847_vm7 = vcmp.eq.f32.partialorder %v846_v17, 8.507059e+37 }
 0xa14   :  { %v1599_v54 = vpop.eup %1598 }
 0xa15   :  { %v838_v9 = vmul.f32 %v1599_v54, %v836_v33  ;;  %vm843_vm4 = vweird.f32 %v1599_v54  ;;  %v1601_v58 = vpop.eup %1600 }
 0xa16   :  { %vm844_vm6 = vmor %vm842_vm5, %vm843_vm4  ;;  %v770_v20 = vadd.f32 1.0, %v1601_v58 }
 0xa17   :  { %v839_v63 = vsub.f32 1.0, %v838_v9 }
 0xa18   :  { %1602 = vrcp.f32 %v770_v20  ;;  %v782_v40 = vand.u32 2147483648, %v770_v20  ;;  %vm776_vm9 = vweird.f32 %v770_v20  ;;  %v780_v8 = vand.u32 2147483647, %v770_v20 }
 0xa19   :  { %v840_v11 = vmul.f32 %v1599_v54, %v839_v63 }
 0xa1a   :  { %v783_v42 = vor.u32 1.1754944e-38, %v782_v40  ;;  %vm781_vm12 = vcmp.eq.f32.partialorder %v780_v8, 8.507059e+37 }
 0xa1b   :  { %v841_v14 = vadd.f32 %v1599_v54, %v840_v11 }
 0xa1d   :  { %v845_v18 = vsel %vm844_vm6, %v1599_v54, %v841_v14 }
 0xa1e   :  { %v850_v21 = vsel %vm847_vm7, %v849_v19, %v845_v18  ;;  %v1603_v29 = vpop.eup %1602 }
 0xa1f   :  { %v772_v32 = vmul.f32 %v1603_v29, %v770_v20  ;;  %vm777_vm8 = vweird.f32 %v1603_v29  ;;  %v853_v7 = vmul.f32 %v850_v21, %v2055_v49 }
 0xa20   :  { %vm778_vm11 = vmor %vm776_vm9, %vm777_vm8 }
 0xa21   :  { %v773_v34 = vsub.f32 1.0, %v772_v32 }
 0xa23   :  { %v774_v36 = vmul.f32 %v1603_v29, %v773_v34 }
 0xa25   :  { %v775_v39 = vadd.f32 %v1603_v29, %v774_v36 }
 0xa27   :  { %v779_v41 = vsel %vm778_vm11, %v1603_v29, %v775_v39 }
 0xa28   :  { %v784_v44 = vsel %vm781_vm12, %v783_v42, %v779_v41 }
 0xa29   :  { %v787_v30 = vmul.f32 %v784_v44, %v2060_v56 }
 0xa5d   :  { %v856_v27 = vpop.permute.xlu2 %855 }
 0xa5e   :  { %v858_v28 = vmul.f32 %v856_v27, %v850_v21 }
 0xa60   :  { %860 = vrot.lane.b32.xlu1 %v858_v28, %s1664_s3 }
 0xa7d   :  { %v790_v15 = vpop.permute.xlu0 %789 }
 0xa7e   :  { %v792_v45 = vmul.f32 %v790_v15, %v784_v44 }
 0xa80   :  { %794 = vrot.lane.b32.xlu2 %v792_v45, %s1664_s3 }
 0xad2   :  { %v861_v48 = vpop.permute.xlu1 %860 }
 0xad3   :  { %v2085_v50 = vadd.f32 %v861_v48, %v853_v7 }
 0xad5   :  { %1604 = vtanh.f32 %v2085_v50 }
 0xada   :  { %v795_v52 = vpop.permute.xlu2 %794 }
 0xadb   :  { %v1605_v38 = vpop.eup %1604  ;;  %v2089_v53 = vadd.f32 %v795_v52, %v787_v30 }
 0xadc   :  { %866 = vrot.lane.b32.xlu0 %v1605_v38, %s1663_s0 }
 0xadd   :  { %1606 = vtanh.f32 %v2089_v53 }
 0xae3   :  { %v1607_v57 = vpop.eup %1606 }
 0xae4   :  { %800 = vrot.lane.b32.xlu1 %v1607_v57, %s1663_s0 }
 0xb4e   :  { %v867_v60 = vpop.permute.xlu0 %866 }
 0xb4f   :  { %v869_v49 = vmul.f32 %v867_v60, %v850_v21 }
 0xb51   :  { %871 = vrot.lane.b32.xlu2 %v869_v49, %s1664_s3 }
 0xb56   :  { %v801_v43 = vpop.permute.xlu1 %800 }
 0xb57   :  { %v803_v3 = vmul.f32 %v801_v43, %v784_v44 }
 0xb59   :  { %805 = vrot.lane.b32.xlu0 %v803_v3, %s1664_s3 }
 0xbab   :  { %v872_v56 = vpop.permute.xlu2 %871 }
 0xbac   :  { %874 = vst.msk [vmem:[#allocation5 + $0x18] sm:$0xff] %vm216_vm10, %v872_v56  ;;  %1488 = vmatmul.msk.f32.vlgmr.msra.gmra.mxu3 %vm216_vm10, %v872_v56 }
 0xbad   :  { %1220 = vmatpush.msra.mxu3 %v1656_v61 }
 0xbaf   :  { %1221 = vmatpush.msra.mxu3 %v1657_v0 }
 0xbb1   :  { %1222 = vmatpush.msra.mxu3 %v1658_v47 }
 0xbb3   :  { %1223 = vmatpush.msra.mxu3 %v1858_v35 }
 0xbcb   :  { %v806_v12 = vpop.permute.xlu0 %805 }
 0xbcc   :  { %808 = vst.msk [vmem:[#allocation4 + $0x20] sm:$0xff] %vm216_vm10, %v806_v12  ;;  %1486 = vmatmul.msk.f32.vlgmr.msra.gmra.mxu2 %vm216_vm10, %v806_v12 }
 0xbcd   :  { %1154 = vmatpush.msra.mxu2 %v1659_v16 }
 0xbcf   :  { %1155 = vmatpush.msra.mxu2 %v1660_v31 }
 0xbd1   :  { %1156 = vmatpush.msra.mxu2 %v1661_v1 }
 0xbd3   :  { %1157 = vmatpush.msra.mxu2 %v1873_v37 }
 0xc2f   :  { %v961_v35 = vpop.f32.mrf.mxu3 }
 0xc30   :  { %v964_v4 = vadd.f32 %v961_v35, %v1916_v55 }
 0xc32   :  { %1608 = vtanh.f32 %v964_v4  ;;  %v1489_v54 = vmul.f32 -1.442695, %v964_v4 }
 0xc38   :  { %v1609_v5 = vpop.eup %1608 }
 0xc39   :  { %987 = vrot.lane.b32.xlu1 %v1609_v5, %s1663_s0 }
 0xc4f   :  { %v895_v13 = vpop.f32.mrf.mxu2 }
 0xc50   :  { %v898_v25 = vadd.f32 %v895_v13, %v1926_v2 }
 0xc52   :  { %1610 = vtanh.f32 %v898_v25  ;;  %v1487_v9 = vmul.f32 -1.442695, %v898_v25 }
 0xc53   :  { %1612 = vpow2.f32 %v1489_v54 }
 0xc54   :  { %1614 = vpow2.f32 %v1487_v9 }
 0xc58   :  { %v1611_v33 = vpop.eup %1610 }
 0xc59   :  { %921 = vrot.lane.b32.xlu2 %v1611_v33, %s1663_s0  ;;  %v1613_v63 = vpop.eup %1612 }
 0xc5a   :  { %v968_v37 = vadd.f32 1.0, %v1613_v63  ;;  %v1615_v59 = vpop.eup %1614 }
 0xc5b   :  { %v902_v55 = vadd.f32 1.0, %v1615_v59 }
 0xc5c   :  { %1616 = vrcp.f32 %v968_v37  ;;  %v980_v20 = vand.u32 2147483648, %v968_v37  ;;  %vm974_vm14 = vweird.f32 %v968_v37  ;;  %v978_v21 = vand.u32 2147483647, %v968_v37 }
 0xc5d   :  { %1618 = vrcp.f32 %v902_v55  ;;  %v914_v40 = vand.u32 2147483648, %v902_v55  ;;  %vm908_vm2 = vweird.f32 %v902_v55  ;;  %v912_v8 = vand.u32 2147483647, %v902_v55 }
 0xc5e   :  { %v981_v29 = vor.u32 1.1754944e-38, %v980_v20  ;;  %vm979_vm0 = vcmp.eq.f32.partialorder %v978_v21, 8.507059e+37 }
 0xc5f   :  { %v915_v42 = vor.u32 1.1754944e-38, %v914_v40  ;;  %vm913_vm4 = vcmp.eq.f32.partialorder %v912_v8, 8.507059e+37 }
 0xc62   :  { %v1617_v11 = vpop.eup %1616 }
 0xc63   :  { %v970_v14 = vmul.f32 %v1617_v11, %v968_v37  ;;  %v1619_v17 = vpop.eup %1618  ;;  %vm975_vm13 = vweird.f32 %v1617_v11 }
 0xc64   :  { %v904_v2 = vmul.f32 %v1619_v17, %v902_v55  ;;  %vm976_vm15 = vmor %vm974_vm14, %vm975_vm13  ;;  %vm909_vm1 = vweird.f32 %v1619_v17  ;;  %vm1437_vm14 = vcmask 39936  }
 0xc65   :  { %v971_v62 = vsub.f32 1.0, %v970_v14  ;;  %vm910_vm3 = vmor %vm908_vm2, %vm909_vm1 }
 0xc66   :  { %v905_v19 = vsub.f32 1.0, %v904_v2 }
 0xc67   :  { %v972_v58 = vmul.f32 %v1617_v11, %v971_v62 }
 0xc68   :  { %v906_v28 = vmul.f32 %v1619_v17, %v905_v19 }
 0xc69   :  { %v973_v18 = vadd.f32 %v1617_v11, %v972_v58 }
 0xc6a   :  { %v907_v39 = vadd.f32 %v1619_v17, %v906_v28 }
 0xc6b   :  { %v977_v27 = vsel %vm976_vm15, %v1617_v11, %v973_v18 }
 0xc6c   :  { %v982_v34 = vsel %vm979_vm0, %v981_v29, %v977_v27  ;;  %v911_v41 = vsel %vm910_vm3, %v1619_v17, %v907_v39 }
 0xc6d   :  { %v916_v15 = vsel %vm913_vm4, %v915_v42, %v911_v41  ;;  %v985_v7 = vmul.f32 %v982_v34, %v2085_v50 }
 0xc6e   :  { %v919_v52 = vmul.f32 %v916_v15, %v2089_v53 }
 0xcab   :  { %v988_v32 = vpop.permute.xlu1 %987 }
 0xcac   :  { %v990_v36 = vmul.f32 %v988_v32, %v982_v34 }
 0xcae   :  { %992 = vrot.lane.b32.xlu0 %v990_v36, %s1664_s3 }
 0xcb3   :  { %v922_v44 = vpop.permute.xlu2 %921 }
 0xcb4   :  { %v924_v45 = vmul.f32 %v922_v44, %v916_v15 }
 0xcb6   :  { %926 = vrot.lane.b32.xlu1 %v924_v45, %s1664_s3 }
 0xd20   :  { %v993_v48 = vpop.permute.xlu0 %992 }
 0xd21   :  { %v2127_v30 = vadd.f32 %v993_v48, %v985_v7  ;;  %v1294_v7 = vld [vmem:[%s2261_s8 + $0x18] sm:$0xff]  ;;  %v1293_v48 = vld [vmem:[%s2261_s8 + $0x10] sm:$0xff] }
 0xd22   :  { %1331 = vmatpush.msra.mxu0 %v1294_v7 }
 0xd23   :  { %1620 = vtanh.f32 %v2127_v30 }
 0xd24   :  { %1332 = vmatpush.msra.mxu0 %v1293_v48 }
 0xd28   :  { %v927_v38 = vpop.permute.xlu1 %926 }
 0xd29   :  { %v1621_v57 = vpop.eup %1620  ;;  %v2131_v60 = vadd.f32 %v927_v38, %v919_v52  ;;  %v1291_v52 = vld [vmem:[%s2261_s8] sm:$0xff] }
 0xd2a   :  { %998 = vrot.lane.b32.xlu2 %v1621_v57, %s1663_s0 }
 0xd2b   :  { %1622 = vtanh.f32 %v2131_v60 }
 0xd31   :  { %v1623_v49 = vpop.eup %1622 }
 0xd32   :  { %932 = vrot.lane.b32.xlu0 %v1623_v49, %s1663_s0 }
 0xd84   :  { %v999_v43 = vpop.permute.xlu2 %998 }
 0xd85   :  { %v1001_v50 = vmul.f32 %v999_v43, %v982_v34  ;;  %v1274_v43 = vld [vmem:[#allocation4 + $0x18] sm:$0xff] }
 0xd87   :  { %1003 = vrot.lane.b32.xlu1 %v1001_v50, %s1664_s3  ;;  %v1286_v50 = vld [vmem:[#allocation5 + $0x18] sm:$0xff] }
 0xda4   :  { %v933_v3 = vpop.permute.xlu0 %932 }
 0xda5   :  { %v935_v56 = vmul.f32 %v933_v3, %v916_v15  ;;  %v1275_v3 = vld [vmem:[#allocation4 + $0x20] sm:$0xff] }
 0xda7   :  { %937 = vrot.lane.b32.xlu2 %v935_v56, %s1664_s3  ;;  %v1287_v56 = vld [vmem:[#allocation5 + $0x20] sm:$0xff] }
 0xdf9   :  { %v1004_v53 = vpop.permute.xlu1 %1003 }
 0xdfa   :  { %1006 = vst.msk [vmem:[#allocation5 + $0x10] sm:$0xff] %vm216_vm10, %v1004_v53  ;;  %1492 = vmatmul.msk.f32.vlgmr.msrb.gmra.mxu3 %vm216_vm10, %v1004_v53 }
 0xdfb   :  { %1518 = vmatpush.msrb.mxu3 %v1953_v22 }
 0xdfd   :  { %1519 = vmatpush.msrb.mxu3 %v1958_v23 }
 0xdff   :  { %1520 = vmatpush.msrb.mxu3 %v1964_v24 }
 0xe01   :  { %v938_v61 = vpop.permute.xlu2 %937  ;;  %1521 = vmatpush.msrb.mxu3 %v1970_v26  ;;  %v1285_v49 = vld [vmem:[#allocation5 + $0x10] sm:$0xff] }
 0xe02   :  { %940 = vst.msk [vmem:[#allocation4 + $0x28] sm:$0xff] %vm216_vm10, %v938_v61  ;;  %1490 = vmatmul.msk.f32.vlgmr.msrb.gmra.mxu2 %vm216_vm10, %v938_v61  ;;  %v1288_v61 = vld [vmem:[#allocation5 + $0x28] sm:$0xff] }
 0xe03   :  { %1514 = vmatpush.msrb.mxu2 %v1294_v7 }
 0xe05   :  { %1515 = vmatpush.msrb.mxu2 %v1293_v48 }
 0xe09   :  { %v1276_v53 = vld [vmem:[#allocation4 + $0x28] sm:$0xff] }
 0xe7d   :  { %v1093_v0 = vpop.f32.mrf.mxu3 }
 0xe7e   :  { %v1096_v47 = vadd.f32 %v1093_v0, %v1912_v51 }
 0xe80   :  { %1624 = vtanh.f32 %v1096_v47  ;;  %v1493_v23 = vmul.f32 -1.442695, %v1096_v47  ;;  %v1289_v47 = vld [vmem:[#allocation5 + $0x30] sm:$0xff] }
 0xe85   :  { %v1027_v12 = vpop.f32.mrf.mxu2 }
 0xe86   :  { %v1625_v16 = vpop.eup %1624  ;;  %v1030_v31 = vadd.f32 %v1027_v12, %v1930_v6  ;;  %v1290_v12 = vld [vmem:[#allocation5 + $0x38] sm:$0xff] }
 0xe87   :  { %1119 = vrot.lane.b32.xlu0 %v1625_v16, %s1663_s0 }
 0xe88   :  { %1626 = vtanh.f32 %v1030_v31  ;;  %v1491_v24 = vmul.f32 -1.442695, %v1030_v31 }
 0xe89   :  { %1628 = vpow2.f32 %v1493_v23 }
 0xe8a   :  { %1630 = vpow2.f32 %v1491_v24 }
 0xe8e   :  { %v1627_v22 = vpop.eup %1626 }
 0xe8f   :  { %1053 = vrot.lane.b32.xlu1 %v1627_v22, %s1663_s0  ;;  %v1629_v26 = vpop.eup %1628 }
 0xe90   :  { %v1100_v1 = vadd.f32 1.0, %v1629_v26  ;;  %v1631_v35 = vpop.eup %1630 }
 0xe91   :  { %v1034_v51 = vadd.f32 1.0, %v1631_v35 }
 0xe92   :  { %1632 = vrcp.f32 %v1100_v1  ;;  %v1112_v63 = vand.u32 2147483648, %v1100_v1  ;;  %vm1106_vm6 = vweird.f32 %v1100_v1  ;;  %v1110_v37 = vand.u32 2147483647, %v1100_v1 }
 0xe93   :  { %1634 = vrcp.f32 %v1034_v51  ;;  %v1046_v2 = vand.u32 2147483648, %v1034_v51  ;;  %vm1040_vm11 = vweird.f32 %v1034_v51  ;;  %v1044_v18 = vand.u32 2147483647, %v1034_v51 }
 0xe94   :  { %v1113_v11 = vor.u32 1.1754944e-38, %v1112_v63  ;;  %vm1111_vm8 = vcmp.eq.f32.partialorder %v1110_v37, 8.507059e+37 }
 0xe95   :  { %v1047_v20 = vor.u32 1.1754944e-38, %v1046_v2  ;;  %vm1045_vm13 = vcmp.eq.f32.partialorder %v1044_v18, 8.507059e+37 }
 0xe98   :  { %v1633_v4 = vpop.eup %1632 }
 0xe99   :  { %v1102_v5 = vmul.f32 %v1633_v4, %v1100_v1  ;;  %v1635_v6 = vpop.eup %1634  ;;  %vm1107_vm5 = vweird.f32 %v1633_v4  ;;  %v2197_v1 = vld [vmem:[%s2262_s9] ss:$0 sm:$0xff] }
 0xe9a   :  { %v1036_v33 = vmul.f32 %v1635_v6, %v1034_v51  ;;  %vm1108_vm7 = vmor %vm1106_vm6, %vm1107_vm5  ;;  %vm1041_vm9 = vweird.f32 %v1635_v6 }
 0xe9b   :  { %v1103_v13 = vsub.f32 1.0, %v1102_v5  ;;  %vm1042_vm12 = vmor %vm1040_vm11, %vm1041_vm9 }
 0xe9c   :  { %v1037_v9 = vsub.f32 1.0, %v1036_v33 }
 0xe9d   :  { %v1104_v25 = vmul.f32 %v1633_v4, %v1103_v13 }
 0xe9e   :  { %v1038_v55 = vmul.f32 %v1635_v6, %v1037_v9 }
 0xe9f   :  { %v1105_v54 = vadd.f32 %v1633_v4, %v1104_v25 }
 0xea0   :  { %v1039_v58 = vadd.f32 %v1635_v6, %v1038_v55 }
 0xea1   :  { %v1109_v59 = vsel %vm1108_vm7, %v1633_v4, %v1105_v54 }
 0xea2   :  { %v1114_v62 = vsel %vm1111_vm8, %v1113_v11, %v1109_v59  ;;  %v1043_v19 = vsel %vm1042_vm12, %v1635_v6, %v1039_v58 }
 0xea3   :  { %v1048_v27 = vsel %vm1045_vm13, %v1047_v20, %v1043_v19  ;;  %v1117_v29 = vmul.f32 %v1114_v62, %v2127_v30  ;;  %v1292_v30 = vld [vmem:[%s2261_s8 + $0x8] sm:$0xff] }
 0xea4   :  { %v1051_v39 = vmul.f32 %v1048_v27, %v2131_v60  ;;  %1516 = vmatpush.msrb.mxu2 %v1292_v30  ;;  %1333 = vmatpush.msra.mxu0 %v1292_v30  ;;  %v1273_v60 = vld [vmem:[#allocation4 + $0x10] sm:$0xff] }
 0xea6   :  { %1517 = vmatpush.msrb.mxu2 %v1291_v52  ;;  %1334 = vmatpush.msra.mxu0 %v1291_v52 }
 0xef9   :  { %v1120_v14 = vpop.permute.xlu0 %1119 }
 0xefa   :  { %v1122_v17 = vmul.f32 %v1120_v14, %v1114_v62 }
 0xefc   :  { %1124 = vrot.lane.b32.xlu2 %v1122_v17, %s1664_s3 }
 0xf01   :  { %v1054_v21 = vpop.permute.xlu1 %1053 }
 0xf02   :  { %v1056_v28 = vmul.f32 %v1054_v21, %v1048_v27 }
 0xf04   :  { %1058 = vrot.lane.b32.xlu0 %v1056_v28, %s1664_s3 }
 0xf56   :  { %v1125_v32 = vpop.permute.xlu2 %1124 }
 0xf57   :  { %v2153_v34 = vadd.f32 %v1125_v32, %v1117_v29 }
 0xf59   :  { %1636 = vtanh.f32 %v2153_v34 }
 0xf5f   :  { %v1637_v36 = vpop.eup %1636 }
 0xf60   :  { %1130 = vrot.lane.b32.xlu1 %v1637_v36, %s1663_s0 }
 0xf76   :  { %v1059_v40 = vpop.permute.xlu0 %1058 }
 0xf77   :  { %v2158_v8 = vadd.f32 %v1059_v40, %v1051_v39 }
 0xf79   :  { %1638 = vtanh.f32 %v2158_v8 }
 0xf7f   :  { %v1639_v41 = vpop.eup %1638 }
 0xf80   :  { %1064 = vrot.lane.b32.xlu2 %v1639_v41, %s1663_s0 }
 0xfd2   :  { %v1131_v42 = vpop.permute.xlu1 %1130 }
 0xfd3   :  { %v1133_v15 = vmul.f32 %v1131_v42, %v1114_v62 }
 0xfd5   :  { %1135 = vrot.lane.b32.xlu0 %v1133_v15, %s1664_s3 }
 0xfda   :  { %v1065_v44 = vpop.permute.xlu2 %1064 }
 0xfdb   :  { %v1067_v45 = vmul.f32 %v1065_v44, %v1048_v27 }
 0xfdd   :  { %1069 = vrot.lane.b32.xlu1 %v1067_v45, %s1664_s3 }
0x1047   :  { %v1136_v38 = vpop.permute.xlu0 %1135 }
0x1048   :  { %1138 = vst.msk [vmem:[#allocation5 + $0x8] sm:$0xff] %vm216_vm10, %v1136_v38  ;;  %1496 = vmatmul.msk.f32.vlgmr.msra.gmra.mxu3 %vm216_vm10, %v1136_v38 }
0x104f   :  { %v1070_v57 = vpop.permute.xlu1 %1069 }
0x1050   :  { %1072 = vst.msk [vmem:[#allocation4 + $0x30] sm:$0xff] %vm216_vm10, %v1070_v57  ;;  %1494 = vmatmul.msk.f32.vlgmr.msra.gmra.mxu2 %vm216_vm10, %v1070_v57  ;;  %1508 = vmatmul.msk.f32.vlgmr.msrb.gmra.mxu3 %vm216_vm10, %v1273_v60 }
0x1057   :  { %v1277_v0 = vld [vmem:[#allocation4 + $0x30] sm:$0xff] }
0x1058   :  { %1500 = vmatmul.msk.f32.vlgmr.msrb.gmra.mxu2 %vm216_vm10, %v1285_v49  ;;  %1509 = vmatmul.msk.f32.gmra.mxu3 %vm216_vm10, %v1274_v43 }
0x1060   :  { %1501 = vmatmul.msk.f32.gmra.mxu2 %vm216_vm10, %v1286_v50  ;;  %1510 = vmatmul.msk.f32.gmra.mxu3 %vm216_vm10, %v1275_v3 }
0x1068   :  { %1502 = vmatmul.msk.f32.gmra.mxu2 %vm216_vm10, %v1287_v56  ;;  %1511 = vmatmul.msk.f32.gmra.mxu3 %vm216_vm10, %v1276_v53 }
0x1070   :  { %1503 = vmatmul.msk.f32.gmra.mxu2 %vm216_vm10, %v1288_v61  ;;  %1512 = vmatmul.msk.f32.gmra.mxu3 %vm216_vm10, %v1277_v0 }
0x1078   :  { %1504 = vmatmul.msk.f32.gmra.mxu2 %vm216_vm10, %v1289_v47 }
0x1080   :  { %1505 = vmatmul.msk.f32.gmra.mxu2 %vm216_vm10, %v1290_v12 }
0x10cb   :  { %v1225_v16 = vpop.f32.mrf.mxu3 }
0x10cc   :  { %v1228_v31 = vadd.f32 %v1225_v16, %v1905_v46 }
0x10ce   :  { %1640 = vtanh.f32 %v1228_v31  ;;  %v1497_v58 = vmul.f32 -1.442695, %v1228_v31 }
0x10d3   :  { %v1159_v22 = vpop.f32.mrf.mxu2  ;;  %v1407_v23 = vpop.f32.mrf.mxu3 }
0x10d4   :  { %v1641_v24 = vpop.eup %1640  ;;  %v1162_v26 = vadd.f32 %v1159_v22, %v1934_v10 }
0x10d5   :  { %1251 = vrot.lane.b32.xlu2 %v1641_v24, %s1663_s0 }
0x10d6   :  { %1642 = vtanh.f32 %v1162_v26  ;;  %v1495_v27 = vmul.f32 -1.442695, %v1162_v26 }
0x10d7   :  { %1644 = vpow2.f32 %v1497_v58 }
0x10db   :  { %v1342_v35 = vpop.f32.mrf.mxu2  ;;  %v1410_v5 = vpop.f32.mrf.mxu3 }
0x10dc   :  { %v1643_v51 = vpop.eup %1642  ;;  %v1408_v4 = vadd.f32 %v1407_v23, %v1342_v35 }
0x10dd   :  { %1185 = vrot.lane.b32.xlu0 %v1643_v51, %s1663_s0  ;;  %v1645_v2 = vpop.eup %1644  ;;  %v1284_v51 = vld [vmem:[#allocation5 + $0x8] sm:$0xff] }
0x10de   :  { %v1431_v46 = vadd.f32 %v2197_v1, %v1408_v4  ;;  %v1232_v18 = vadd.f32 1.0, %v1645_v2 }
0x10e0   :  { %1440 = vst.msk [vmem:[%s2263_s10 + $0x10] sm:$0xff] %vm1437_vm14, %v1431_v46  ;;  %1646 = vrcp.f32 %v1232_v18  ;;  %v1244_v32 = vand.u32 2147483648, %v1232_v18  ;;  %vm1238_vm0 = vweird.f32 %v1232_v18  ;;  %v1242_v36 = vand.u32 2147483647, %v1232_v18  ;;  %v1401_v46 = vpop.f32.mrf.mxu1 }
0x10e1   :  { %1648 = vpow2.f32 %v1495_v27 }
0x10e2   :  { %v1245_v41 = vor.u32 1.1754944e-38, %v1244_v32  ;;  %vm1243_vm2 = vcmp.eq.f32.partialorder %v1242_v36, 8.507059e+37 }
0x10e3   :  { %v1345_v10 = vpop.f32.mrf.mxu2  ;;  %v1413_v25 = vpop.f32.mrf.mxu3 }
0x10e4   :  { %v1411_v13 = vadd.f32 %v1410_v5, %v1345_v10 }
0x10e6   :  { %v1432_v6 = vadd.f32 %v2197_v1, %v1411_v13  ;;  %v1647_v19 = vpop.eup %1646 }
0x10e7   :  { %v1234_v20 = vmul.f32 %v1647_v19, %v1232_v18  ;;  %vm1239_vm15 = vweird.f32 %v1647_v19  ;;  %v1649_v39 = vpop.eup %1648 }
0x10e8   :  { %1441 = vst.msk [vmem:[%s2263_s10 + $0x18] sm:$0xff] %vm1437_vm14, %v1432_v6  ;;  %vm1240_vm1 = vmor %vm1238_vm0, %vm1239_vm15  ;;  %v1166_v42 = vadd.f32 1.0, %v1649_v39 }
0x10e9   :  { %v1235_v21 = vsub.f32 1.0, %v1234_v20 }
0x10ea   :  { %1650 = vrcp.f32 %v1166_v42  ;;  %v1178_v57 = vand.u32 2147483648, %v1166_v42  ;;  %vm1172_vm4 = vweird.f32 %v1166_v42  ;;  %v1176_v60 = vand.u32 2147483647, %v1166_v42 }
0x10eb   :  { %v1348_v33 = vpop.f32.mrf.mxu2  ;;  %v1416_v63 = vpop.f32.mrf.mxu3  ;;  %v1236_v28 = vmul.f32 %v1647_v19, %v1235_v21 }
0x10ec   :  { %v1414_v54 = vadd.f32 %v1413_v25, %v1348_v33  ;;  %v1179_v43 = vor.u32 1.1754944e-38, %v1178_v57  ;;  %vm1177_vm6 = vcmp.eq.f32.partialorder %v1176_v60, 8.507059e+37  ;;  %v1404_v25 = vpop.f32.mrf.mxu1 }
0x10ed   :  { %v1237_v29 = vadd.f32 %v1647_v19, %v1236_v28 }
0x10ee   :  { %v1433_v9 = vadd.f32 %v2197_v1, %v1414_v54 }
0x10ef   :  { %v1241_v40 = vsel %vm1240_vm1, %v1647_v19, %v1237_v29 }
0x10f0   :  { %1442 = vst.msk [vmem:[%s2263_s10 + $0x20] sm:$0xff] %vm1437_vm14, %v1433_v9  ;;  %v1246_v15 = vsel %vm1243_vm2, %v1245_v41, %v1241_v40  ;;  %v1651_v7 = vpop.eup %1650 }
0x10f1   :  { %v1168_v48 = vmul.f32 %v1651_v7, %v1166_v42  ;;  %vm1173_vm3 = vweird.f32 %v1651_v7  ;;  %v1249_v53 = vmul.f32 %v1246_v15, %v2153_v34 }
0x10f2   :  { %vm1174_vm5 = vmor %vm1172_vm4, %vm1173_vm3 }
0x10f3   :  { %v1351_v37 = vpop.f32.mrf.mxu2  ;;  %v1419_v11 = vpop.f32.mrf.mxu3  ;;  %v1169_v30 = vsub.f32 1.0, %v1168_v48 }
0x10f4   :  { %v1417_v59 = vadd.f32 %v1416_v63, %v1351_v37 }
0x10f5   :  { %v1170_v52 = vmul.f32 %v1651_v7, %v1169_v30 }
0x10f6   :  { %v1434_v55 = vadd.f32 %v2197_v1, %v1417_v59 }
0x10f7   :  { %v1171_v38 = vadd.f32 %v1651_v7, %v1170_v52 }
0x10f8   :  { %1443 = vst.msk [vmem:[%s2263_s10 + $0x28] sm:$0xff] %vm1437_vm14, %v1434_v55 }
0x10f9   :  { %v1175_v49 = vsel %vm1174_vm5, %v1651_v7, %v1171_v38 }
0x10fa   :  { %v1180_v3 = vsel %vm1177_vm6, %v1179_v43, %v1175_v49 }
0x10fb   :  { %v1354_v14 = vpop.f32.mrf.mxu2  ;;  %v1183_v47 = vmul.f32 %v1180_v3, %v2158_v8 }
0x10fc   :  { %v1420_v62 = vadd.f32 %v1419_v11, %v1354_v14 }
0x10fe   :  { %v1435_v17 = vadd.f32 %v2197_v1, %v1420_v62 }
0x1100   :  { %1444 = vst.msk [vmem:[%s2263_s10 + $0x30] sm:$0xff] %vm1437_vm14, %v1435_v17 }
0x1103   :  { %v1357_v63 = vpop.f32.mrf.mxu2 }
0x112f   :  { %v1252_v44 = vpop.permute.xlu2 %1251 }
0x1130   :  { %v1254_v45 = vmul.f32 %v1252_v44, %v1246_v15 }
0x1132   :  { %1256 = vrot.lane.b32.xlu1 %v1254_v45, %s1664_s3 }
0x114f   :  { %v1186_v50 = vpop.permute.xlu0 %1185 }
0x1150   :  { %v1188_v56 = vmul.f32 %v1186_v50, %v1180_v3 }
0x1152   :  { %1190 = vrot.lane.b32.xlu2 %v1188_v56, %s1664_s3 }
0x11a4   :  { %v1257_v61 = vpop.permute.xlu1 %1256 }
0x11a5   :  { %v1259_v0 = vadd.f32 %v1257_v61, %v1249_v53 }
0x11a7   :  { %1652 = vtanh.f32 %v1259_v0 }
0x11ac   :  { %v1191_v12 = vpop.permute.xlu2 %1190 }
0x11ad   :  { %v1653_v16 = vpop.eup %1652  ;;  %v1193_v31 = vadd.f32 %v1191_v12, %v1183_v47 }
0x11ae   :  { %1262 = vrot.lane.b32.xlu0 %v1653_v16, %s1663_s0 }
0x11af   :  { %1654 = vtanh.f32 %v1193_v31 }
0x11b5   :  { %v1655_v22 = vpop.eup %1654 }
0x11b6   :  { %1196 = vrot.lane.b32.xlu1 %v1655_v22, %s1663_s0 }
0x1220   :  { %v1263_v23 = vpop.permute.xlu0 %1262 }
0x1221   :  { %v1265_v24 = vmul.f32 %v1263_v23, %v1246_v15 }
0x1223   :  { %1267 = vrot.lane.b32.xlu2 %v1265_v24, %s1664_s3 }
0x1228   :  { %v1197_v26 = vpop.permute.xlu1 %1196 }
0x1229   :  { %v1199_v34 = vmul.f32 %v1197_v26, %v1180_v3 }
0x122b   :  { %1201 = vrot.lane.b32.xlu0 %v1199_v34, %s1664_s3 }
0x127d   :  { %v1268_v35 = vpop.permute.xlu2 %1267 }
0x127e   :  { %1270 = vst.msk [vmem:[#allocation5] sm:$0xff] %vm216_vm10, %v1268_v35 }
0x1285   :  { %v1283_v8 = vld [vmem:[#allocation5] sm:$0xff] }
0x1286   :  { %1498 = vmatmul.msk.f32.vlgmr.msra.gmra.mxu0 %vm216_vm10, %v1283_v8 }
0x128e   :  { %1499 = vmatmul.msk.f32.gmra.mxu0 %vm216_vm10, %v1284_v51 }
0x129d   :  { %v1202_v4 = vpop.permute.xlu0 %1201 }
0x129e   :  { %1204 = vst.msk [vmem:[#allocation4 + $0x38] sm:$0xff] %vm216_vm10, %v1202_v4 }
0x12a5   :  { %v1278_v5 = vld [vmem:[#allocation4 + $0x38] sm:$0xff] }
0x12a6   :  { %1513 = vmatmul.msk.f32.gmra.mxu3 %vm216_vm10, %v1278_v5 }
0x1303   :  { %v1336_v10 = vpop.f32.mrf.mxu0 }
0x1304   :  { %v1402_v13 = vadd.f32 %v1401_v46, %v1336_v10 }
0x1306   :  { %v1429_v6 = vadd.f32 %v2197_v1, %v1402_v13 }
0x1308   :  { %1438 = vst.msk [vmem:[%s2263_s10] sm:$0xff] %vm1437_vm14, %v1429_v6 }
0x130b   :  { %v1339_v33 = vpop.f32.mrf.mxu0 }
0x130c   :  { %v1405_v54 = vadd.f32 %v1404_v25, %v1339_v33 }
0x130e   :  { %v1430_v9 = vadd.f32 %v2197_v1, %v1405_v54 }
0x1310   :  { %1439 = vst.msk [vmem:[%s2263_s10 + $0x8] sm:$0xff] %vm1437_vm14, %v1430_v9 }
0x1329   :  { %v1422_v37 = vpop.f32.mrf.mxu3 }
0x132a   :  { %v1423_v59 = vadd.f32 %v1422_v37, %v1357_v63 }
0x132c   :  { %v1436_v55 = vadd.f32 %v2197_v1, %v1423_v59 }
0x132e   :  { %1445 = vst.msk [vmem:[%s2263_s10 + $0x38] sm:$0xff] %vm1437_vm14, %v1436_v55 }

</bundles_post_ra>
